<compile_context>
chip_gen: v6e
topology: v6e:2x2x1
jax: 0.10.0
libtpu: 0.0.40
codegen_flags: <defaults>
</compile_context>

<pallas_src>
import functools

import jax
import jax.numpy as jnp
from jax.experimental import pallas as pl
from jax.experimental.pallas import tpu as pltpu

# ---------------- small synthetic config (scaled down from embedding_dim=768) --------
EMBED_DIM = 32
NUM_CLASSES = 10
NUM_HEADS = 2                 # module default
HEAD_DIM = EMBED_DIM // NUM_HEADS
N_UNSUP = 8                   # n_unsup_concepts (10 -> 8, kept equal so branches stack)
N_CONCEPTS = 8                # n_concepts
N_SPATIAL = 8                 # n_spatial_concepts
NUM_ITER = 1                  # ConceptSlotAttention(num_iterations=1)
N_TOKENS = 16                 # token sequence length fed to forward(x)
BATCH = 2
EPS = 1e-8
N_BRANCHES = 3
assert N_UNSUP == N_CONCEPTS == N_SPATIAL


# =============================== fused Pallas kernel ==================================

def _branch_kernel(x_ref, ln_ref, wkv_ref, wq_ref, slots0_ref,
                   wih_ref, whh_ref, bgru_ref, wm1_ref, wm2_ref, bmlp_ref,
                   spos_ref, cwq_ref, cwkv_ref, cwp_ref, cbp_ref,
                   attn_ref, out_ref, *, num_heads, head_dim, num_iter, eps):
    """One (branch, batch-element) step: slot attention + pos add + cross attention.

    Shapes inside the kernel (N tokens, S slots, D embed, C classes):
      x (N, D), ln (6, D), wkv (D, 2D), wq (D, D), slots0 (S, D), wih/whh (D, 3D),
      bgru (2, 3D), wm1/wm2 (D, D), bmlp (2, D), spos (S, D),
      cwq (D, D), cwkv (D, 2D), cwp (D, C), cbp (1, C)
    Outputs: attn (N, S) head-mean cross-attention, out (1, C) token-mean class logits.
    """
    f32 = jnp.float32
    x = x_ref[...]                                     # (N, D)
    D = x.shape[-1]
    ln = ln_ref[...]                                   # (6, D)

    def lnorm(t, row):
        g = ln[row:row + 1, :]
        b = ln[row + 1:row + 2, :]
        mu = jnp.mean(t, axis=-1, keepdims=True)
        var = jnp.mean((t - mu) * (t - mu), axis=-1, keepdims=True)
        return (t - mu) * jax.lax.rsqrt(var + 1e-5) * g + b

    def softmax_last(logits):
        m = jnp.max(logits, axis=-1, keepdims=True)
        e = jnp.exp(logits - m)
        return e * pl.reciprocal(jnp.sum(e, axis=-1, keepdims=True), approx=True)

    nt_dims = (((1,), (1,)), ((), ()))                 # contract last dims (A @ B^T)

    # -------- ConceptSlotAttention (num_iterations = 1), entirely in VMEM ------------
    # TODO(synk): reference ConceptSlotAttention source not provided; standard slot
    # attention (learned-mu init, GRU + residual MLP, deterministic/eval) implemented.
    xn = lnorm(x, 0)
    kv = jnp.dot(xn, wkv_ref[...], preferred_element_type=f32)          # (N, 2D)
    k = kv[:, :D] * (float(D) ** -0.5)
    v = kv[:, D:]
    slots = slots0_ref[...]                                             # (S, D)
    bgru = bgru_ref[...]                                                # (2, 3D)
    bmlp = bmlp_ref[...]                                                # (2, D)

    for _ in range(num_iter):
        slots_prev = slots
        q = jnp.dot(lnorm(slots, 2), wq_ref[...], preferred_element_type=f32)   # (S, D)
        # transposed logits layout (S, N): keeps every matmul NT/NN (no transposes)
        logits_t = jax.lax.dot_general(q, k, nt_dims, preferred_element_type=f32)  # (S, N)
        m = jnp.max(logits_t, axis=0, keepdims=True)
        e = jnp.exp(logits_t - m)
        attn_t = e * pl.reciprocal(jnp.sum(e, axis=0, keepdims=True), approx=True)  # softmax over slots
        w_t = attn_t + eps
        w_t = w_t * pl.reciprocal(jnp.sum(w_t, axis=-1, keepdims=True), approx=True)  # weighted mean over tokens
        upd = jnp.dot(w_t, v, preferred_element_type=f32)                # (S, D)
        # GRUCell (PyTorch gate order r, z, n)
        gi = jnp.dot(upd, wih_ref[...], preferred_element_type=f32) + bgru[0:1, :]
        gh = jnp.dot(slots_prev, whh_ref[...], preferred_element_type=f32) + bgru[1:2, :]
        r = jax.nn.sigmoid(gi[:, :D] + gh[:, :D])
        z = jax.nn.sigmoid(gi[:, D:2 * D] + gh[:, D:2 * D])
        n = jnp.tanh(gi[:, 2 * D:] + r * gh[:, 2 * D:])
        slots = (1.0 - z) * n + z * slots_prev
        # residual MLP
        mm = lnorm(slots, 4)
        mm = jax.nn.relu(jnp.dot(mm, wm1_ref[...], preferred_element_type=f32) + bmlp[0:1, :])
        mm = jnp.dot(mm, wm2_ref[...], preferred_element_type=f32) + bmlp[1:2, :]
        slots = slots + mm

    concepts = slots + spos_ref[...]                                     # (S, D)

    # -------- CrossAttention(x, concepts); head-mean & token-mean fused in-kernel ----
    q_all = jnp.dot(x, cwq_ref[...], preferred_element_type=f32)         # (N, D)
    kv_all = jnp.dot(concepts, cwkv_ref[...], preferred_element_type=f32)  # (S, 2D)
    cwp = cwp_ref[...]                                                   # (D, C)
    scale = float(head_dim) ** -0.5

    attn_acc = None
    out_row = cbp_ref[...]                                               # (1, C)
    for h in range(num_heads):
        lo, hi = h * head_dim, (h + 1) * head_dim
        qh = q_all[:, lo:hi]
        kh = kv_all[:, lo:hi]                  # K columns of fused KV
        vh = kv_all[:, D + lo:D + hi]          # V columns of fused KV
        lg = jax.lax.dot_general(qh, kh, nt_dims, preferred_element_type=f32) * scale  # (N, S)
        ah = softmax_last(lg)                                            # (N, S)
        attn_acc = ah if attn_acc is None else attn_acc + ah
        # token mean commutes with the (linear) value aggregation + output projection:
        ah_mean = jnp.mean(ah, axis=0, keepdims=True)                    # (1, S)
        ctx_h = jnp.dot(ah_mean, vh, preferred_element_type=f32)         # (1, Dh)
        out_row = out_row + jnp.dot(ctx_h, cwp[lo:hi, :], preferred_element_type=f32)

    attn_ref[...] = attn_acc * (1.0 / num_heads)                         # (N, S) head mean
    out_ref[...] = out_row                                               # (1, C) token mean


def fused_branches(x, pk):
    """Run all three concept branches with one pallas_call, grid = (branch, batch)."""
    G, S, D = pk['slots0'].shape
    B, N, _ = x.shape
    C = pk['ca_wp'].shape[-1]
    kern = functools.partial(_branch_kernel, num_heads=NUM_HEADS, head_dim=HEAD_DIM,
                             num_iter=NUM_ITER, eps=EPS)

    def bspec(tail):
        nzeros = len(tail)
        return pl.BlockSpec((None,) + tail, lambda g, b, _n=nzeros: (g,) + (0,) * _n)

    in_specs = [
        pl.BlockSpec((None, N, D), lambda g, b: (b, 0, 0)),   # x (shared across branches)
        bspec((6, D)),            # ln: [in_g, in_b, slots_g, slots_b, mlp_g, mlp_b]
        bspec((D, 2 * D)),        # wkv (fused k|v projection)
        bspec((D, D)),            # wq
        bspec((S, D)),            # slots init (learned mu)
        bspec((D, 3 * D)),        # gru w_ih
        bspec((D, 3 * D)),        # gru w_hh
        bspec((2, 3 * D)),        # gru biases [b_ih; b_hh]
        bspec((D, D)),            # mlp w1
        bspec((D, D)),            # mlp w2
        bspec((2, D)),            # mlp biases [b1; b2]
        bspec((S, D)),            # slot positional embedding
        bspec((D, D)),            # cross-attn wq
        bspec((D, 2 * D)),        # cross-attn wkv
        bspec((D, C)),            # cross-attn proj weight
        bspec((1, C)),            # cross-attn proj bias
    ]
    out_specs = (
        pl.BlockSpec((None, None, N, S), lambda g, b: (g, b, 0, 0)),   # head-mean attn
        pl.BlockSpec((None, None, 1, C), lambda g, b: (g, b, 0, 0)),   # token-mean logits
    )
    out_shape = (
        jax.ShapeDtypeStruct((G, B, N, S), jnp.float32),
        jax.ShapeDtypeStruct((G, B, 1, C), jnp.float32),
    )
    return pl.pallas_call(
        kern,
        grid=(G, B),
        in_specs=in_specs,
        out_specs=out_specs,
        out_shape=out_shape,
        compiler_params=pltpu.CompilerParams(
            dimension_semantics=("parallel", "parallel")),
    )(x, pk['ln'], pk['wkv'], pk['wq'], pk['slots0'], pk['wih'], pk['whh'],
      pk['bgru'], pk['wm1'], pk['wm2'], pk['bmlp'], pk['spos'],
      pk['ca_wq'], pk['ca_wkv'], pk['ca_wp'], pk['ca_bp'])


# =============================== forward (module semantics) ==========================

def concept_centric_transformer_swin_sa_forward(pk, x):
    """CoceptCentricTransformerSwinSA.forward.  x: (B, N, D) token features."""
    attn_all, out_all = fused_branches(x, pk)
    # out = out_unsup.mean(1) + out_n.mean(1) + out_s.mean(1)  (token means done in-kernel)
    out = jnp.sum(out_all[:, :, 0, :], axis=0)                  # (B, num_classes)
    unsup_concept_attn = attn_all[0]                            # (B, N, n_unsup)
    concept_attn = jnp.mean(attn_all[1], axis=1)                # extra token mean -> (B, n_concepts)
    spatial_concept_attn = attn_all[2]                          # (B, N, n_spatial)
    return out, unsup_concept_attn, concept_attn, spatial_concept_attn


# =============================== params ===============================================

def xavier_uniform(key, shape):
    limit = (6.0 / (shape[0] + shape[1])) ** 0.5
    return jax.random.uniform(key, shape, jnp.float32, -limit, limit)


def init_slot_attention(key, num_slots):
    D = EMBED_DIM
    ks = jax.random.split(key, 8)
    return {
        'norm_in_g': jnp.ones((D,), jnp.float32), 'norm_in_b': jnp.zeros((D,), jnp.float32),
        'norm_slots_g': jnp.ones((D,), jnp.float32), 'norm_slots_b': jnp.zeros((D,), jnp.float32),
        'norm_mlp_g': jnp.ones((D,), jnp.float32), 'norm_mlp_b': jnp.zeros((D,), jnp.float32),
        'wq': xavier_uniform(ks[0], (D, D)),
        'wk': xavier_uniform(ks[1], (D, D)),
        'wv': xavier_uniform(ks[2], (D, D)),
        'slots_mu': xavier_uniform(ks[3], (num_slots, D)),
        'gru_w_ih': xavier_uniform(ks[4], (D, 3 * D)),
        'gru_w_hh': xavier_uniform(ks[5], (D, 3 * D)),
        'gru_b_ih': jnp.zeros((3 * D,), jnp.float32),
        'gru_b_hh': jnp.zeros((3 * D,), jnp.float32),
        'mlp_w1': xavier_uniform(ks[6], (D, D)),       # mlp_hidden_size == embedding_dim
        'mlp_b1': jnp.zeros((D,), jnp.float32),
        'mlp_w2': xavier_uniform(ks[7], (D, D)),
        'mlp_b2': jnp.zeros((D,), jnp.float32),
    }


def init_cross_attention(key):
    D = EMBED_DIM
    ks = jax.random.split(key, 3)
    return {
        'wq': xavier_uniform(ks[0], (D, D)),            # qkv_bias=False
        'wkv': xavier_uniform(ks[1], (D, 2 * D)),
        'wproj': xavier_uniform(ks[2], (D, NUM_CLASSES)),
        'bproj': jnp.zeros((NUM_CLASSES,), jnp.float32),
    }


def init_params(key):
    D = EMBED_DIM
    ks = jax.random.split(key, 5)
    return {
        'unsup_sa': init_slot_attention(ks[0], N_UNSUP),
        'unsup_slot_pos': jnp.zeros((1, 1, N_UNSUP * D), jnp.float32),
        'concept_sa': init_slot_attention(ks[1], N_CONCEPTS),
        'concept_slot_pos': jnp.zeros((1, 1, N_CONCEPTS * D), jnp.float32),
        'concept_ca': init_cross_attention(ks[2]),
        'spatial_sa': init_slot_attention(ks[3], N_SPATIAL),
        'spatial_slot_pos': jnp.zeros((1, 1, N_SPATIAL * D), jnp.float32),
        'spatial_ca': init_cross_attention(ks[4]),
        # TODO(synk): the reference also builds unsup_concept_tranformer, but forward
        # never calls it (it reuses concept_tranformer for the unsup branch); omitted.
    }


def pack_params(p):
    """Stack per-branch weights along a leading branch axis (done once, outside jit)."""
    D = EMBED_DIM
    sas = [p['unsup_sa'], p['concept_sa'], p['spatial_sa']]
    # quirk replicated: unsup AND concept branches both use concept_tranformer weights.
    cas = [p['concept_ca'], p['concept_ca'], p['spatial_ca']]
    pos = [p['unsup_slot_pos'], p['concept_slot_pos'], p['spatial_slot_pos']]
    return {
        'ln': jnp.stack([jnp.stack([m['norm_in_g'], m['norm_in_b'],
                                    m['norm_slots_g'], m['norm_slots_b'],
                                    m['norm_mlp_g'], m['norm_mlp_b']]) for m in sas]),
        'wkv': jnp.stack([jnp.concatenate([m['wk'], m['wv']], axis=1) for m in sas]),
        'wq': jnp.stack([m['wq'] for m in sas]),
        'slots0': jnp.stack([m['slots_mu'] for m in sas]),
        'wih': jnp.stack([m['gru_w_ih'] for m in sas]),
        'whh': jnp.stack([m['gru_w_hh'] for m in sas]),
        'bgru': jnp.stack([jnp.stack([m['gru_b_ih'], m['gru_b_hh']]) for m in sas]),
        'wm1': jnp.stack([m['mlp_w1'] for m in sas]),
        'wm2': jnp.stack([m['mlp_w2'] for m in sas]),
        'bmlp': jnp.stack([jnp.stack([m['mlp_b1'], m['mlp_b2']]) for m in sas]),
        'spos': jnp.stack([sp.reshape(-1, D) for sp in pos]),
        'ca_wq': jnp.stack([c['wq'] for c in cas]),
        'ca_wkv': jnp.stack([c['wkv'] for c in cas]),
        'ca_wp': jnp.stack([c['wproj'] for c in cas]),
        'ca_bp': jnp.stack([c['bproj'].reshape(1, -1) for c in cas]),
    }


# =============================== main =================================================

if __name__ == "__main__":
    key = jax.random.PRNGKey(0)
    kp, kx = jax.random.split(key)
    params = init_params(kp)
    packed = pack_params(params)
    x = jax.random.normal(kx, (BATCH, N_TOKENS, EMBED_DIM), jnp.float32)  # token features

    fwd = jax.jit(concept_centric_transformer_swin_sa_forward)
    out, unsup_attn, concept_attn, spatial_attn = jax.block_until_ready(fwd(packed, x))

    assert out.shape == (BATCH, NUM_CLASSES)
    assert unsup_attn.shape == (BATCH, N_TOKENS, N_UNSUP)
    assert concept_attn.shape == (BATCH, N_CONCEPTS)
    assert spatial_attn.shape == (BATCH, N_TOKENS, N_SPATIAL)
    assert bool(jnp.all(jnp.isfinite(out)))
    assert bool(jnp.all(jnp.isfinite(unsup_attn)))
    assert bool(jnp.all(jnp.isfinite(concept_attn)))
    assert bool(jnp.all(jnp.isfinite(spatial_attn)))
    print("KERNEL_OK")
</pallas_src>

<mosaic_0001>
module attributes {stable_mosaic.version = 11 : i64} {
  func.func @_branch_kernel(%arg0: i32, %arg1: i32, %arg2: memref<1x16x32xf32, #tpu.memory_space<vmem>>, %arg3: memref<1x6x32xf32, #tpu.memory_space<vmem>>, %arg4: memref<1x32x64xf32, #tpu.memory_space<vmem>>, %arg5: memref<1x32x32xf32, #tpu.memory_space<vmem>>, %arg6: memref<1x8x32xf32, #tpu.memory_space<vmem>>, %arg7: memref<1x32x96xf32, #tpu.memory_space<vmem>>, %arg8: memref<1x32x96xf32, #tpu.memory_space<vmem>>, %arg9: memref<1x2x96xf32, #tpu.memory_space<vmem>>, %arg10: memref<1x32x32xf32, #tpu.memory_space<vmem>>, %arg11: memref<1x32x32xf32, #tpu.memory_space<vmem>>, %arg12: memref<1x2x32xf32, #tpu.memory_space<vmem>>, %arg13: memref<1x8x32xf32, #tpu.memory_space<vmem>>, %arg14: memref<1x32x32xf32, #tpu.memory_space<vmem>>, %arg15: memref<1x32x64xf32, #tpu.memory_space<vmem>>, %arg16: memref<1x32x10xf32, #tpu.memory_space<vmem>>, %arg17: memref<1x1x10xf32, #tpu.memory_space<vmem>>, %arg18: memref<1x1x16x8xf32, #tpu.memory_space<vmem>>, %arg19: memref<1x1x1x10xf32, #tpu.memory_space<vmem>>) attributes {dimension_semantics = [#tpu.dimension_semantics<parallel>, #tpu.dimension_semantics<parallel>], iteration_bounds = array<i64: 3, 2>, scalar_prefetch = 0 : i64, scratch_operands = 0 : i64, tpu.core_type = #tpu.core_type<tc>, window_params = [{transform_indices = @transform_0, window_bounds = array<i64: 1, 16, 32>}, {transform_indices = @transform_1, window_bounds = array<i64: 1, 6, 32>}, {transform_indices = @transform_2, window_bounds = array<i64: 1, 32, 64>}, {transform_indices = @transform_3, window_bounds = array<i64: 1, 32, 32>}, {transform_indices = @transform_4, window_bounds = array<i64: 1, 8, 32>}, {transform_indices = @transform_5, window_bounds = array<i64: 1, 32, 96>}, {transform_indices = @transform_6, window_bounds = array<i64: 1, 32, 96>}, {transform_indices = @transform_7, window_bounds = array<i64: 1, 2, 96>}, {transform_indices = @transform_8, window_bounds = array<i64: 1, 32, 32>}, {transform_indices = @transform_9, window_bounds = array<i64: 1, 32, 32>}, {transform_indices = @transform_10, window_bounds = array<i64: 1, 2, 32>}, {transform_indices = @transform_11, window_bounds = array<i64: 1, 8, 32>}, {transform_indices = @transform_12, window_bounds = array<i64: 1, 32, 32>}, {transform_indices = @transform_13, window_bounds = array<i64: 1, 32, 64>}, {transform_indices = @transform_14, window_bounds = array<i64: 1, 32, 10>}, {transform_indices = @transform_15, window_bounds = array<i64: 1, 1, 10>}, {transform_indices = @transform_16, window_bounds = array<i64: 1, 1, 16, 8>}, {transform_indices = @transform_17, window_bounds = array<i64: 1, 1, 1, 10>}]} {
    %c0 = arith.constant 0 : index
    %c0_0 = arith.constant 0 : index
    %c0_1 = arith.constant 0 : index
    %0 = vector.load %arg2[%c0, %c0_0, %c0_1] : memref<1x16x32xf32, #tpu.memory_space<vmem>>, vector<1x16x32xf32>
    %1 = vector.shape_cast %0 : vector<1x16x32xf32> to vector<16x32xf32>
    %c0_2 = arith.constant 0 : index
    %c0_3 = arith.constant 0 : index
    %c0_4 = arith.constant 0 : index
    %2 = vector.load %arg3[%c0_2, %c0_3, %c0_4] : memref<1x6x32xf32, #tpu.memory_space<vmem>>, vector<1x6x32xf32>
    %3 = vector.shape_cast %2 : vector<1x6x32xf32> to vector<6x32xf32>
    %4 = vector.extract_strided_slice %3 {offsets = [0, 0], sizes = [1, 32], strides = [1, 1]} : vector<6x32xf32> to vector<1x32xf32>
    %5 = vector.extract_strided_slice %3 {offsets = [1, 0], sizes = [1, 32], strides = [1, 1]} : vector<6x32xf32> to vector<1x32xf32>
    %cst = arith.constant dense<0.000000e+00> : vector<16xf32>
    %6 = vector.multi_reduction <add>, %1, %cst [1] : vector<16x32xf32> to vector<16xf32>
    %7 = vector.shape_cast %6 : vector<16xf32> to vector<16x1xf32>
    %cst_5 = arith.constant 3.200000e+01 : f32
    %8 = vector.broadcast %cst_5 : f32 to vector<16x1xf32>
    %9 = arith.divf %7, %8 : vector<16x1xf32>
    %10 = vector.broadcast %9 : vector<16x1xf32> to vector<16x32xf32>
    %11 = arith.subf %1, %10 : vector<16x32xf32>
    %12 = vector.broadcast %9 : vector<16x1xf32> to vector<16x32xf32>
    %13 = arith.subf %1, %12 : vector<16x32xf32>
    %14 = arith.mulf %11, %13 : vector<16x32xf32>
    %cst_6 = arith.constant dense<0.000000e+00> : vector<16xf32>
    %15 = vector.multi_reduction <add>, %14, %cst_6 [1] : vector<16x32xf32> to vector<16xf32>
    %16 = vector.shape_cast %15 : vector<16xf32> to vector<16x1xf32>
    %cst_7 = arith.constant 3.200000e+01 : f32
    %17 = vector.broadcast %cst_7 : f32 to vector<16x1xf32>
    %18 = arith.divf %16, %17 : vector<16x1xf32>
    %19 = vector.broadcast %9 : vector<16x1xf32> to vector<16x32xf32>
    %20 = arith.subf %1, %19 : vector<16x32xf32>
    %cst_8 = arith.constant 9.99999974E-6 : f32
    %21 = vector.broadcast %cst_8 : f32 to vector<16x1xf32>
    %22 = arith.addf %18, %21 : vector<16x1xf32>
    %23 = math.rsqrt %22 : vector<16x1xf32>
    %24 = vector.broadcast %23 : vector<16x1xf32> to vector<16x32xf32>
    %25 = arith.mulf %20, %24 : vector<16x32xf32>
    %26 = vector.broadcast %4 : vector<1x32xf32> to vector<16x32xf32>
    %27 = arith.mulf %25, %26 : vector<16x32xf32>
    %28 = vector.broadcast %5 : vector<1x32xf32> to vector<16x32xf32>
    %29 = arith.addf %27, %28 : vector<16x32xf32>
    %c0_9 = arith.constant 0 : index
    %c0_10 = arith.constant 0 : index
    %c0_11 = arith.constant 0 : index
    %30 = vector.load %arg4[%c0_9, %c0_10, %c0_11] : memref<1x32x64xf32, #tpu.memory_space<vmem>>, vector<1x32x64xf32>
    %31 = vector.shape_cast %30 : vector<1x32x64xf32> to vector<32x64xf32>
    %cst_12 = arith.constant dense<0.000000e+00> : vector<16x64xf32>
    %32 = tpu.matmul %29, %31, %cst_12 {dimension_numbers = #tpu.dot_dimension_numbers<[1], [0], [0], [1], [0, 0, 1, 1], [], []>} : vector<16x32xf32>, vector<32x64xf32>, vector<16x64xf32> -> vector<16x64xf32>
    %33 = vector.extract_strided_slice %32 {offsets = [0, 0], sizes = [16, 32], strides = [1, 1]} : vector<16x64xf32> to vector<16x32xf32>
    %cst_13 = arith.constant 0.176776692 : f32
    %34 = vector.broadcast %cst_13 : f32 to vector<16x32xf32>
    %35 = arith.mulf %33, %34 : vector<16x32xf32>
    %36 = vector.extract_strided_slice %32 {offsets = [0, 32], sizes = [16, 32], strides = [1, 1]} : vector<16x64xf32> to vector<16x32xf32>
    %c0_14 = arith.constant 0 : index
    %c0_15 = arith.constant 0 : index
    %c0_16 = arith.constant 0 : index
    %37 = vector.load %arg6[%c0_14, %c0_15, %c0_16] : memref<1x8x32xf32, #tpu.memory_space<vmem>>, vector<1x8x32xf32>
    %38 = vector.shape_cast %37 : vector<1x8x32xf32> to vector<8x32xf32>
    %c0_17 = arith.constant 0 : index
    %c0_18 = arith.constant 0 : index
    %c0_19 = arith.constant 0 : index
    %39 = vector.load %arg9[%c0_17, %c0_18, %c0_19] : memref<1x2x96xf32, #tpu.memory_space<vmem>>, vector<1x2x96xf32>
    %40 = vector.shape_cast %39 : vector<1x2x96xf32> to vector<2x96xf32>
    %c0_20 = arith.constant 0 : index
    %c0_21 = arith.constant 0 : index
    %c0_22 = arith.constant 0 : index
    %41 = vector.load %arg12[%c0_20, %c0_21, %c0_22] : memref<1x2x32xf32, #tpu.memory_space<vmem>>, vector<1x2x32xf32>
    %42 = vector.shape_cast %41 : vector<1x2x32xf32> to vector<2x32xf32>
    %43 = vector.extract_strided_slice %3 {offsets = [2, 0], sizes = [1, 32], strides = [1, 1]} : vector<6x32xf32> to vector<1x32xf32>
    %44 = vector.extract_strided_slice %3 {offsets = [3, 0], sizes = [1, 32], strides = [1, 1]} : vector<6x32xf32> to vector<1x32xf32>
    %cst_23 = arith.constant dense<0.000000e+00> : vector<8xf32>
    %45 = vector.multi_reduction <add>, %38, %cst_23 [1] : vector<8x32xf32> to vector<8xf32>
    %46 = vector.shape_cast %45 : vector<8xf32> to vector<8x1xf32>
    %cst_24 = arith.constant 3.200000e+01 : f32
    %47 = vector.broadcast %cst_24 : f32 to vector<8x1xf32>
    %48 = arith.divf %46, %47 : vector<8x1xf32>
    %49 = vector.broadcast %48 : vector<8x1xf32> to vector<8x32xf32>
    %50 = arith.subf %38, %49 : vector<8x32xf32>
    %51 = vector.broadcast %48 : vector<8x1xf32> to vector<8x32xf32>
    %52 = arith.subf %38, %51 : vector<8x32xf32>
    %53 = arith.mulf %50, %52 : vector<8x32xf32>
    %cst_25 = arith.constant dense<0.000000e+00> : vector<8xf32>
    %54 = vector.multi_reduction <add>, %53, %cst_25 [1] : vector<8x32xf32> to vector<8xf32>
    %55 = vector.shape_cast %54 : vector<8xf32> to vector<8x1xf32>
    %cst_26 = arith.constant 3.200000e+01 : f32
    %56 = vector.broadcast %cst_26 : f32 to vector<8x1xf32>
    %57 = arith.divf %55, %56 : vector<8x1xf32>
    %58 = vector.broadcast %48 : vector<8x1xf32> to vector<8x32xf32>
    %59 = arith.subf %38, %58 : vector<8x32xf32>
    %cst_27 = arith.constant 9.99999974E-6 : f32
    %60 = vector.broadcast %cst_27 : f32 to vector<8x1xf32>
    %61 = arith.addf %57, %60 : vector<8x1xf32>
    %62 = math.rsqrt %61 : vector<8x1xf32>
    %63 = vector.broadcast %62 : vector<8x1xf32> to vector<8x32xf32>
    %64 = arith.mulf %59, %63 : vector<8x32xf32>
    %65 = vector.broadcast %43 : vector<1x32xf32> to vector<8x32xf32>
    %66 = arith.mulf %64, %65 : vector<8x32xf32>
    %67 = vector.broadcast %44 : vector<1x32xf32> to vector<8x32xf32>
    %68 = arith.addf %66, %67 : vector<8x32xf32>
    %c0_28 = arith.constant 0 : index
    %c0_29 = arith.constant 0 : index
    %c0_30 = arith.constant 0 : index
    %69 = vector.load %arg5[%c0_28, %c0_29, %c0_30] : memref<1x32x32xf32, #tpu.memory_space<vmem>>, vector<1x32x32xf32>
    %70 = vector.shape_cast %69 : vector<1x32x32xf32> to vector<32x32xf32>
    %cst_31 = arith.constant dense<0.000000e+00> : vector<8x32xf32>
    %71 = tpu.matmul %68, %70, %cst_31 {dimension_numbers = #tpu.dot_dimension_numbers<[1], [0], [0], [1], [0, 0, 1, 1], [], []>} : vector<8x32xf32>, vector<32x32xf32>, vector<8x32xf32> -> vector<8x32xf32>
    %cst_32 = arith.constant dense<0.000000e+00> : vector<8x16xf32>
    %72 = tpu.matmul %71, %35, %cst_32 {dimension_numbers = #tpu.dot_dimension_numbers<[1], [1], [0], [0], [0, 0, 1, 0], [], []>} : vector<8x32xf32>, vector<16x32xf32>, vector<8x16xf32> -> vector<8x16xf32>
    %cst_33 = arith.constant dense<0xFF800000> : vector<16xf32>
    %73 = vector.multi_reduction <maximumf>, %72, %cst_33 [0] : vector<8x16xf32> to vector<16xf32>
    %74 = vector.shape_cast %73 : vector<16xf32> to vector<1x16xf32>
    %75 = vector.broadcast %74 : vector<1x16xf32> to vector<8x16xf32>
    %76 = arith.subf %72, %75 : vector<8x16xf32>
    %77 = math.exp %76 : vector<8x16xf32>
    %cst_34 = arith.constant dense<0.000000e+00> : vector<16xf32>
    %78 = vector.multi_reduction <add>, %77, %cst_34 [0] : vector<8x16xf32> to vector<16xf32>
    %79 = vector.shape_cast %78 : vector<16xf32> to vector<1x16xf32>
    %80 = tpu.reciprocal %79 {approx = true} : vector<1x16xf32> -> vector<1x16xf32>
    %81 = vector.broadcast %80 : vector<1x16xf32> to vector<8x16xf32>
    %82 = arith.mulf %77, %81 : vector<8x16xf32>
    %cst_35 = arith.constant 9.99999993E-9 : f32
    %83 = vector.broadcast %cst_35 : f32 to vector<8x16xf32>
    %84 = arith.addf %82, %83 : vector<8x16xf32>
    %cst_36 = arith.constant dense<0.000000e+00> : vector<8xf32>
    %85 = vector.multi_reduction <add>, %84, %cst_36 [1] : vector<8x16xf32> to vector<8xf32>
    %86 = vector.shape_cast %85 : vector<8xf32> to vector<8x1xf32>
    %87 = tpu.reciprocal %86 {approx = true} : vector<8x1xf32> -> vector<8x1xf32>
    %88 = vector.broadcast %87 : vector<8x1xf32> to vector<8x16xf32>
    %89 = arith.mulf %84, %88 : vector<8x16xf32>
    %cst_37 = arith.constant dense<0.000000e+00> : vector<8x32xf32>
    %90 = tpu.matmul %89, %36, %cst_37 {dimension_numbers = #tpu.dot_dimension_numbers<[1], [0], [0], [1], [0, 0, 1, 1], [], []>} : vector<8x16xf32>, vector<16x32xf32>, vector<8x32xf32> -> vector<8x32xf32>
    %c0_38 = arith.constant 0 : index
    %c0_39 = arith.constant 0 : index
    %c0_40 = arith.constant 0 : index
    %91 = vector.load %arg7[%c0_38, %c0_39, %c0_40] : memref<1x32x96xf32, #tpu.memory_space<vmem>>, vector<1x32x96xf32>
    %92 = vector.shape_cast %91 : vector<1x32x96xf32> to vector<32x96xf32>
    %cst_41 = arith.constant dense<0.000000e+00> : vector<8x96xf32>
    %93 = tpu.matmul %90, %92, %cst_41 {dimension_numbers = #tpu.dot_dimension_numbers<[1], [0], [0], [1], [0, 0, 1, 1], [], []>} : vector<8x32xf32>, vector<32x96xf32>, vector<8x96xf32> -> vector<8x96xf32>
    %94 = vector.extract_strided_slice %40 {offsets = [0, 0], sizes = [1, 96], strides = [1, 1]} : vector<2x96xf32> to vector<1x96xf32>
    %95 = vector.broadcast %94 : vector<1x96xf32> to vector<8x96xf32>
    %96 = arith.addf %93, %95 : vector<8x96xf32>
    %c0_42 = arith.constant 0 : index
    %c0_43 = arith.constant 0 : index
    %c0_44 = arith.constant 0 : index
    %97 = vector.load %arg8[%c0_42, %c0_43, %c0_44] : memref<1x32x96xf32, #tpu.memory_space<vmem>>, vector<1x32x96xf32>
    %98 = vector.shape_cast %97 : vector<1x32x96xf32> to vector<32x96xf32>
    %cst_45 = arith.constant dense<0.000000e+00> : vector<8x96xf32>
    %99 = tpu.matmul %38, %98, %cst_45 {dimension_numbers = #tpu.dot_dimension_numbers<[1], [0], [0], [1], [0, 0, 1, 1], [], []>} : vector<8x32xf32>, vector<32x96xf32>, vector<8x96xf32> -> vector<8x96xf32>
    %100 = vector.extract_strided_slice %40 {offsets = [1, 0], sizes = [1, 96], strides = [1, 1]} : vector<2x96xf32> to vector<1x96xf32>
    %101 = vector.broadcast %100 : vector<1x96xf32> to vector<8x96xf32>
    %102 = arith.addf %99, %101 : vector<8x96xf32>
    %103 = vector.extract_strided_slice %96 {offsets = [0, 0], sizes = [8, 32], strides = [1, 1]} : vector<8x96xf32> to vector<8x32xf32>
    %104 = vector.extract_strided_slice %102 {offsets = [0, 0], sizes = [8, 32], strides = [1, 1]} : vector<8x96xf32> to vector<8x32xf32>
    %105 = arith.addf %103, %104 : vector<8x32xf32>
    %106 = arith.negf %105 : vector<8x32xf32>
    %107 = math.exp %106 : vector<8x32xf32>
    %cst_46 = arith.constant 1.000000e+00 : f32
    %108 = vector.broadcast %cst_46 : f32 to vector<8x32xf32>
    %109 = arith.addf %108, %107 : vector<8x32xf32>
    %110 = arith.divf %108, %109 : vector<8x32xf32>
    %111 = vector.extract_strided_slice %96 {offsets = [0, 32], sizes = [8, 32], strides = [1, 1]} : vector<8x96xf32> to vector<8x32xf32>
    %112 = vector.extract_strided_slice %102 {offsets = [0, 32], sizes = [8, 32], strides = [1, 1]} : vector<8x96xf32> to vector<8x32xf32>
    %113 = arith.addf %111, %112 : vector<8x32xf32>
    %114 = arith.negf %113 : vector<8x32xf32>
    %115 = math.exp %114 : vector<8x32xf32>
    %cst_47 = arith.constant 1.000000e+00 : f32
    %116 = vector.broadcast %cst_47 : f32 to vector<8x32xf32>
    %117 = arith.addf %116, %115 : vector<8x32xf32>
    %118 = arith.divf %116, %117 : vector<8x32xf32>
    %119 = vector.extract_strided_slice %96 {offsets = [0, 64], sizes = [8, 32], strides = [1, 1]} : vector<8x96xf32> to vector<8x32xf32>
    %120 = vector.extract_strided_slice %102 {offsets = [0, 64], sizes = [8, 32], strides = [1, 1]} : vector<8x96xf32> to vector<8x32xf32>
    %121 = arith.mulf %110, %120 : vector<8x32xf32>
    %122 = arith.addf %119, %121 : vector<8x32xf32>
    %123 = math.tanh %122 : vector<8x32xf32>
    %cst_48 = arith.constant 1.000000e+00 : f32
    %124 = vector.broadcast %cst_48 : f32 to vector<8x32xf32>
    %125 = arith.subf %124, %118 : vector<8x32xf32>
    %126 = arith.mulf %125, %123 : vector<8x32xf32>
    %127 = arith.mulf %118, %38 : vector<8x32xf32>
    %128 = arith.addf %126, %127 : vector<8x32xf32>
    %129 = vector.extract_strided_slice %3 {offsets = [4, 0], sizes = [1, 32], strides = [1, 1]} : vector<6x32xf32> to vector<1x32xf32>
    %130 = vector.extract_strided_slice %3 {offsets = [5, 0], sizes = [1, 32], strides = [1, 1]} : vector<6x32xf32> to vector<1x32xf32>
    %cst_49 = arith.constant dense<0.000000e+00> : vector<8xf32>
    %131 = vector.multi_reduction <add>, %128, %cst_49 [1] : vector<8x32xf32> to vector<8xf32>
    %132 = vector.shape_cast %131 : vector<8xf32> to vector<8x1xf32>
    %cst_50 = arith.constant 3.200000e+01 : f32
    %133 = vector.broadcast %cst_50 : f32 to vector<8x1xf32>
    %134 = arith.divf %132, %133 : vector<8x1xf32>
    %135 = vector.broadcast %134 : vector<8x1xf32> to vector<8x32xf32>
    %136 = arith.subf %128, %135 : vector<8x32xf32>
    %137 = vector.broadcast %134 : vector<8x1xf32> to vector<8x32xf32>
    %138 = arith.subf %128, %137 : vector<8x32xf32>
    %139 = arith.mulf %136, %138 : vector<8x32xf32>
    %cst_51 = arith.constant dense<0.000000e+00> : vector<8xf32>
    %140 = vector.multi_reduction <add>, %139, %cst_51 [1] : vector<8x32xf32> to vector<8xf32>
    %141 = vector.shape_cast %140 : vector<8xf32> to vector<8x1xf32>
    %cst_52 = arith.constant 3.200000e+01 : f32
    %142 = vector.broadcast %cst_52 : f32 to vector<8x1xf32>
    %143 = arith.divf %141, %142 : vector<8x1xf32>
    %144 = vector.broadcast %134 : vector<8x1xf32> to vector<8x32xf32>
    %145 = arith.subf %128, %144 : vector<8x32xf32>
    %cst_53 = arith.constant 9.99999974E-6 : f32
    %146 = vector.broadcast %cst_53 : f32 to vector<8x1xf32>
    %147 = arith.addf %143, %146 : vector<8x1xf32>
    %148 = math.rsqrt %147 : vector<8x1xf32>
    %149 = vector.broadcast %148 : vector<8x1xf32> to vector<8x32xf32>
    %150 = arith.mulf %145, %149 : vector<8x32xf32>
    %151 = vector.broadcast %129 : vector<1x32xf32> to vector<8x32xf32>
    %152 = arith.mulf %150, %151 : vector<8x32xf32>
    %153 = vector.broadcast %130 : vector<1x32xf32> to vector<8x32xf32>
    %154 = arith.addf %152, %153 : vector<8x32xf32>
    %c0_54 = arith.constant 0 : index
    %c0_55 = arith.constant 0 : index
    %c0_56 = arith.constant 0 : index
    %155 = vector.load %arg10[%c0_54, %c0_55, %c0_56] : memref<1x32x32xf32, #tpu.memory_space<vmem>>, vector<1x32x32xf32>
    %156 = vector.shape_cast %155 : vector<1x32x32xf32> to vector<32x32xf32>
    %cst_57 = arith.constant dense<0.000000e+00> : vector<8x32xf32>
    %157 = tpu.matmul %154, %156, %cst_57 {dimension_numbers = #tpu.dot_dimension_numbers<[1], [0], [0], [1], [0, 0, 1, 1], [], []>} : vector<8x32xf32>, vector<32x32xf32>, vector<8x32xf32> -> vector<8x32xf32>
    %158 = vector.extract_strided_slice %42 {offsets = [0, 0], sizes = [1, 32], strides = [1, 1]} : vector<2x32xf32> to vector<1x32xf32>
    %159 = vector.broadcast %158 : vector<1x32xf32> to vector<8x32xf32>
    %160 = arith.addf %157, %159 : vector<8x32xf32>
    %cst_58 = arith.constant 0.000000e+00 : f32
    %161 = vector.broadcast %cst_58 : f32 to vector<8x32xf32>
    %162 = arith.maximumf %160, %161 : vector<8x32xf32>
    %c0_59 = arith.constant 0 : index
    %c0_60 = arith.constant 0 : index
    %c0_61 = arith.constant 0 : index
    %163 = vector.load %arg11[%c0_59, %c0_60, %c0_61] : memref<1x32x32xf32, #tpu.memory_space<vmem>>, vector<1x32x32xf32>
    %164 = vector.shape_cast %163 : vector<1x32x32xf32> to vector<32x32xf32>
    %cst_62 = arith.constant dense<0.000000e+00> : vector<8x32xf32>
    %165 = tpu.matmul %162, %164, %cst_62 {dimension_numbers = #tpu.dot_dimension_numbers<[1], [0], [0], [1], [0, 0, 1, 1], [], []>} : vector<8x32xf32>, vector<32x32xf32>, vector<8x32xf32> -> vector<8x32xf32>
    %166 = vector.extract_strided_slice %42 {offsets = [1, 0], sizes = [1, 32], strides = [1, 1]} : vector<2x32xf32> to vector<1x32xf32>
    %167 = vector.broadcast %166 : vector<1x32xf32> to vector<8x32xf32>
    %168 = arith.addf %165, %167 : vector<8x32xf32>
    %169 = arith.addf %128, %168 : vector<8x32xf32>
    %c0_63 = arith.constant 0 : index
    %c0_64 = arith.constant 0 : index
    %c0_65 = arith.constant 0 : index
    %170 = vector.load %arg13[%c0_63, %c0_64, %c0_65] : memref<1x8x32xf32, #tpu.memory_space<vmem>>, vector<1x8x32xf32>
    %171 = vector.shape_cast %170 : vector<1x8x32xf32> to vector<8x32xf32>
    %172 = arith.addf %169, %171 : vector<8x32xf32>
    %c0_66 = arith.constant 0 : index
    %c0_67 = arith.constant 0 : index
    %c0_68 = arith.constant 0 : index
    %173 = vector.load %arg14[%c0_66, %c0_67, %c0_68] : memref<1x32x32xf32, #tpu.memory_space<vmem>>, vector<1x32x32xf32>
    %174 = vector.shape_cast %173 : vector<1x32x32xf32> to vector<32x32xf32>
    %cst_69 = arith.constant dense<0.000000e+00> : vector<16x32xf32>
    %175 = tpu.matmul %1, %174, %cst_69 {dimension_numbers = #tpu.dot_dimension_numbers<[1], [0], [0], [1], [0, 0, 1, 1], [], []>} : vector<16x32xf32>, vector<32x32xf32>, vector<16x32xf32> -> vector<16x32xf32>
    %c0_70 = arith.constant 0 : index
    %c0_71 = arith.constant 0 : index
    %c0_72 = arith.constant 0 : index
    %176 = vector.load %arg15[%c0_70, %c0_71, %c0_72] : memref<1x32x64xf32, #tpu.memory_space<vmem>>, vector<1x32x64xf32>
    %177 = vector.shape_cast %176 : vector<1x32x64xf32> to vector<32x64xf32>
    %cst_73 = arith.constant dense<0.000000e+00> : vector<8x64xf32>
    %178 = tpu.matmul %172, %177, %cst_73 {dimension_numbers = #tpu.dot_dimension_numbers<[1], [0], [0], [1], [0, 0, 1, 1], [], []>} : vector<8x32xf32>, vector<32x64xf32>, vector<8x64xf32> -> vector<8x64xf32>
    %c0_74 = arith.constant 0 : index
    %c0_75 = arith.constant 0 : index
    %c0_76 = arith.constant 0 : index
    %179 = vector.load %arg16[%c0_74, %c0_75, %c0_76] : memref<1x32x10xf32, #tpu.memory_space<vmem>>, vector<1x32x10xf32>
    %180 = vector.shape_cast %179 : vector<1x32x10xf32> to vector<32x10xf32>
    %c0_77 = arith.constant 0 : index
    %c0_78 = arith.constant 0 : index
    %c0_79 = arith.constant 0 : index
    %181 = vector.load %arg17[%c0_77, %c0_78, %c0_79] : memref<1x1x10xf32, #tpu.memory_space<vmem>>, vector<1x1x10xf32>
    %182 = vector.shape_cast %181 : vector<1x1x10xf32> to vector<1x10xf32>
    %183 = vector.extract_strided_slice %175 {offsets = [0, 0], sizes = [16, 16], strides = [1, 1]} : vector<16x32xf32> to vector<16x16xf32>
    %184 = vector.extract_strided_slice %178 {offsets = [0, 0], sizes = [8, 16], strides = [1, 1]} : vector<8x64xf32> to vector<8x16xf32>
    %185 = vector.extract_strided_slice %178 {offsets = [0, 32], sizes = [8, 16], strides = [1, 1]} : vector<8x64xf32> to vector<8x16xf32>
    %cst_80 = arith.constant dense<0.000000e+00> : vector<16x8xf32>
    %186 = tpu.matmul %183, %184, %cst_80 {dimension_numbers = #tpu.dot_dimension_numbers<[1], [1], [0], [0], [0, 0, 1, 0], [], []>} : vector<16x16xf32>, vector<8x16xf32>, vector<16x8xf32> -> vector<16x8xf32>
    %cst_81 = arith.constant 2.500000e-01 : f32
    %187 = vector.broadcast %cst_81 : f32 to vector<16x8xf32>
    %188 = arith.mulf %186, %187 : vector<16x8xf32>
    %cst_82 = arith.constant dense<0xFF800000> : vector<16xf32>
    %189 = vector.multi_reduction <maximumf>, %188, %cst_82 [1] : vector<16x8xf32> to vector<16xf32>
    %190 = vector.shape_cast %189 : vector<16xf32> to vector<16x1xf32>
    %191 = vector.broadcast %190 : vector<16x1xf32> to vector<16x8xf32>
    %192 = arith.subf %188, %191 : vector<16x8xf32>
    %193 = math.exp %192 : vector<16x8xf32>
    %cst_83 = arith.constant dense<0.000000e+00> : vector<16xf32>
    %194 = vector.multi_reduction <add>, %193, %cst_83 [1] : vector<16x8xf32> to vector<16xf32>
    %195 = vector.shape_cast %194 : vector<16xf32> to vector<16x1xf32>
    %196 = tpu.reciprocal %195 {approx = true} : vector<16x1xf32> -> vector<16x1xf32>
    %197 = vector.broadcast %196 : vector<16x1xf32> to vector<16x8xf32>
    %198 = arith.mulf %193, %197 : vector<16x8xf32>
    %cst_84 = arith.constant dense<0.000000e+00> : vector<8xf32>
    %199 = vector.multi_reduction <add>, %198, %cst_84 [0] : vector<16x8xf32> to vector<8xf32>
    %200 = vector.shape_cast %199 : vector<8xf32> to vector<1x8xf32>
    %cst_85 = arith.constant 1.600000e+01 : f32
    %201 = vector.broadcast %cst_85 : f32 to vector<1x8xf32>
    %202 = arith.divf %200, %201 : vector<1x8xf32>
    %cst_86 = arith.constant dense<0.000000e+00> : vector<1x16xf32>
    %203 = tpu.matmul %202, %185, %cst_86 {dimension_numbers = #tpu.dot_dimension_numbers<[1], [0], [0], [1], [0, 0, 1, 1], [], []>} : vector<1x8xf32>, vector<8x16xf32>, vector<1x16xf32> -> vector<1x16xf32>
    %204 = vector.extract_strided_slice %180 {offsets = [0, 0], sizes = [16, 10], strides = [1, 1]} : vector<32x10xf32> to vector<16x10xf32>
    %cst_87 = arith.constant dense<0.000000e+00> : vector<1x10xf32>
    %205 = tpu.matmul %203, %204, %cst_87 {dimension_numbers = #tpu.dot_dimension_numbers<[1], [0], [0], [1], [0, 0, 1, 1], [], []>} : vector<1x16xf32>, vector<16x10xf32>, vector<1x10xf32> -> vector<1x10xf32>
    %206 = arith.addf %182, %205 : vector<1x10xf32>
    %207 = vector.extract_strided_slice %175 {offsets = [0, 16], sizes = [16, 16], strides = [1, 1]} : vector<16x32xf32> to vector<16x16xf32>
    %208 = vector.extract_strided_slice %178 {offsets = [0, 16], sizes = [8, 16], strides = [1, 1]} : vector<8x64xf32> to vector<8x16xf32>
    %209 = vector.extract_strided_slice %178 {offsets = [0, 48], sizes = [8, 16], strides = [1, 1]} : vector<8x64xf32> to vector<8x16xf32>
    %cst_88 = arith.constant dense<0.000000e+00> : vector<16x8xf32>
    %210 = tpu.matmul %207, %208, %cst_88 {dimension_numbers = #tpu.dot_dimension_numbers<[1], [1], [0], [0], [0, 0, 1, 0], [], []>} : vector<16x16xf32>, vector<8x16xf32>, vector<16x8xf32> -> vector<16x8xf32>
    %cst_89 = arith.constant 2.500000e-01 : f32
    %211 = vector.broadcast %cst_89 : f32 to vector<16x8xf32>
    %212 = arith.mulf %210, %211 : vector<16x8xf32>
    %cst_90 = arith.constant dense<0xFF800000> : vector<16xf32>
    %213 = vector.multi_reduction <maximumf>, %212, %cst_90 [1] : vector<16x8xf32> to vector<16xf32>
    %214 = vector.shape_cast %213 : vector<16xf32> to vector<16x1xf32>
    %215 = vector.broadcast %214 : vector<16x1xf32> to vector<16x8xf32>
    %216 = arith.subf %212, %215 : vector<16x8xf32>
    %217 = math.exp %216 : vector<16x8xf32>
    %cst_91 = arith.constant dense<0.000000e+00> : vector<16xf32>
    %218 = vector.multi_reduction <add>, %217, %cst_91 [1] : vector<16x8xf32> to vector<16xf32>
    %219 = vector.shape_cast %218 : vector<16xf32> to vector<16x1xf32>
    %220 = tpu.reciprocal %219 {approx = true} : vector<16x1xf32> -> vector<16x1xf32>
    %221 = vector.broadcast %220 : vector<16x1xf32> to vector<16x8xf32>
    %222 = arith.mulf %217, %221 : vector<16x8xf32>
    %223 = arith.addf %198, %222 : vector<16x8xf32>
    %cst_92 = arith.constant dense<0.000000e+00> : vector<8xf32>
    %224 = vector.multi_reduction <add>, %222, %cst_92 [0] : vector<16x8xf32> to vector<8xf32>
    %225 = vector.shape_cast %224 : vector<8xf32> to vector<1x8xf32>
    %cst_93 = arith.constant 1.600000e+01 : f32
    %226 = vector.broadcast %cst_93 : f32 to vector<1x8xf32>
    %227 = arith.divf %225, %226 : vector<1x8xf32>
    %cst_94 = arith.constant dense<0.000000e+00> : vector<1x16xf32>
    %228 = tpu.matmul %227, %209, %cst_94 {dimension_numbers = #tpu.dot_dimension_numbers<[1], [0], [0], [1], [0, 0, 1, 1], [], []>} : vector<1x8xf32>, vector<8x16xf32>, vector<1x16xf32> -> vector<1x16xf32>
    %229 = vector.extract_strided_slice %180 {offsets = [16, 0], sizes = [16, 10], strides = [1, 1]} : vector<32x10xf32> to vector<16x10xf32>
    %cst_95 = arith.constant dense<0.000000e+00> : vector<1x10xf32>
    %230 = tpu.matmul %228, %229, %cst_95 {dimension_numbers = #tpu.dot_dimension_numbers<[1], [0], [0], [1], [0, 0, 1, 1], [], []>} : vector<1x16xf32>, vector<16x10xf32>, vector<1x10xf32> -> vector<1x10xf32>
    %231 = arith.addf %206, %230 : vector<1x10xf32>
    %cst_96 = arith.constant 5.000000e-01 : f32
    %232 = vector.broadcast %cst_96 : f32 to vector<16x8xf32>
    %233 = arith.mulf %223, %232 : vector<16x8xf32>
    %c0_97 = arith.constant 0 : index
    %c0_98 = arith.constant 0 : index
    %c0_99 = arith.constant 0 : index
    %c0_100 = arith.constant 0 : index
    %234 = vector.load %arg18[%c0_97, %c0_98, %c0_99, %c0_100] : memref<1x1x16x8xf32, #tpu.memory_space<vmem>>, vector<1x1x16x8xf32>
    %235 = vector.shape_cast %234 : vector<1x1x16x8xf32> to vector<16x8xf32>
    %236 = vector.shape_cast %233 : vector<16x8xf32> to vector<1x1x16x8xf32>
    tpu.vector_store %arg18[%c0_97, %c0_98, %c0_99, %c0_100], %236 {strides = array<i32>} : memref<1x1x16x8xf32, #tpu.memory_space<vmem>>, vector<1x1x16x8xf32>,
    %c0_101 = arith.constant 0 : index
    %c0_102 = arith.constant 0 : index
    %c0_103 = arith.constant 0 : index
    %c0_104 = arith.constant 0 : index
    %237 = vector.load %arg19[%c0_101, %c0_102, %c0_103, %c0_104] : memref<1x1x1x10xf32, #tpu.memory_space<vmem>>, vector<1x1x1x10xf32>
    %238 = vector.shape_cast %237 : vector<1x1x1x10xf32> to vector<1x10xf32>
    %239 = vector.shape_cast %231 : vector<1x10xf32> to vector<1x1x1x10xf32>
    tpu.vector_store %arg19[%c0_101, %c0_102, %c0_103, %c0_104], %239 {strides = array<i32>} : memref<1x1x1x10xf32, #tpu.memory_space<vmem>>, vector<1x1x1x10xf32>,
    return
  }
  func.func @transform_0(%arg0: i32, %arg1: i32) -> (i32, i32, i32) {
    %c0_i32 = arith.constant 0 : i32
    %c0_i32_0 = arith.constant 0 : i32
    %c0_i32_1 = arith.constant 0 : i32
    return %arg1, %c0_i32, %c0_i32_0 : i32, i32, i32
  }
  func.func @transform_1(%arg0: i32, %arg1: i32) -> (i32, i32, i32) {
    %c0_i32 = arith.constant 0 : i32
    %c0_i32_0 = arith.constant 0 : i32
    %c0_i32_1 = arith.constant 0 : i32
    return %arg0, %c0_i32, %c0_i32_0 : i32, i32, i32
  }
  func.func @transform_2(%arg0: i32, %arg1: i32) -> (i32, i32, i32) {
    %c0_i32 = arith.constant 0 : i32
    %c0_i32_0 = arith.constant 0 : i32
    %c0_i32_1 = arith.constant 0 : i32
    return %arg0, %c0_i32, %c0_i32_0 : i32, i32, i32
  }
  func.func @transform_3(%arg0: i32, %arg1: i32) -> (i32, i32, i32) {
    %c0_i32 = arith.constant 0 : i32
    %c0_i32_0 = arith.constant 0 : i32
    %c0_i32_1 = arith.constant 0 : i32
    return %arg0, %c0_i32, %c0_i32_0 : i32, i32, i32
  }
  func.func @transform_4(%arg0: i32, %arg1: i32) -> (i32, i32, i32) {
    %c0_i32 = arith.constant 0 : i32
    %c0_i32_0 = arith.constant 0 : i32
    %c0_i32_1 = arith.constant 0 : i32
    return %arg0, %c0_i32, %c0_i32_0 : i32, i32, i32
  }
  func.func @transform_5(%arg0: i32, %arg1: i32) -> (i32, i32, i32) {
    %c0_i32 = arith.constant 0 : i32
    %c0_i32_0 = arith.constant 0 : i32
    %c0_i32_1 = arith.constant 0 : i32
    return %arg0, %c0_i32, %c0_i32_0 : i32, i32, i32
  }
  func.func @transform_6(%arg0: i32, %arg1: i32) -> (i32, i32, i32) {
    %c0_i32 = arith.constant 0 : i32
    %c0_i32_0 = arith.constant 0 : i32
    %c0_i32_1 = arith.constant 0 : i32
    return %arg0, %c0_i32, %c0_i32_0 : i32, i32, i32
  }
  func.func @transform_7(%arg0: i32, %arg1: i32) -> (i32, i32, i32) {
    %c0_i32 = arith.constant 0 : i32
    %c0_i32_0 = arith.constant 0 : i32
    %c0_i32_1 = arith.constant 0 : i32
    return %arg0, %c0_i32, %c0_i32_0 : i32, i32, i32
  }
  func.func @transform_8(%arg0: i32, %arg1: i32) -> (i32, i32, i32) {
    %c0_i32 = arith.constant 0 : i32
    %c0_i32_0 = arith.constant 0 : i32
    %c0_i32_1 = arith.constant 0 : i32
    return %arg0, %c0_i32, %c0_i32_0 : i32, i32, i32
  }
  func.func @transform_9(%arg0: i32, %arg1: i32) -> (i32, i32, i32) {
    %c0_i32 = arith.constant 0 : i32
    %c0_i32_0 = arith.constant 0 : i32
    %c0_i32_1 = arith.constant 0 : i32
    return %arg0, %c0_i32, %c0_i32_0 : i32, i32, i32
  }
  func.func @transform_10(%arg0: i32, %arg1: i32) -> (i32, i32, i32) {
    %c0_i32 = arith.constant 0 : i32
    %c0_i32_0 = arith.constant 0 : i32
    %c0_i32_1 = arith.constant 0 : i32
    return %arg0, %c0_i32, %c0_i32_0 : i32, i32, i32
  }
  func.func @transform_11(%arg0: i32, %arg1: i32) -> (i32, i32, i32) {
    %c0_i32 = arith.constant 0 : i32
    %c0_i32_0 = arith.constant 0 : i32
    %c0_i32_1 = arith.constant 0 : i32
    return %arg0, %c0_i32, %c0_i32_0 : i32, i32, i32
  }
  func.func @transform_12(%arg0: i32, %arg1: i32) -> (i32, i32, i32) {
    %c0_i32 = arith.constant 0 : i32
    %c0_i32_0 = arith.constant 0 : i32
    %c0_i32_1 = arith.constant 0 : i32
    return %arg0, %c0_i32, %c0_i32_0 : i32, i32, i32
  }
  func.func @transform_13(%arg0: i32, %arg1: i32) -> (i32, i32, i32) {
    %c0_i32 = arith.constant 0 : i32
    %c0_i32_0 = arith.constant 0 : i32
    %c0_i32_1 = arith.constant 0 : i32
    return %arg0, %c0_i32, %c0_i32_0 : i32, i32, i32
  }
  func.func @transform_14(%arg0: i32, %arg1: i32) -> (i32, i32, i32) {
    %c0_i32 = arith.constant 0 : i32
    %c0_i32_0 = arith.constant 0 : i32
    %c0_i32_1 = arith.constant 0 : i32
    return %arg0, %c0_i32, %c0_i32_0 : i32, i32, i32
  }
  func.func @transform_15(%arg0: i32, %arg1: i32) -> (i32, i32, i32) {
    %c0_i32 = arith.constant 0 : i32
    %c0_i32_0 = arith.constant 0 : i32
    %c0_i32_1 = arith.constant 0 : i32
    return %arg0, %c0_i32, %c0_i32_0 : i32, i32, i32
  }
  func.func @transform_16(%arg0: i32, %arg1: i32) -> (i32, i32, i32, i32) {
    %c0_i32 = arith.constant 0 : i32
    %c0_i32_0 = arith.constant 0 : i32
    %c0_i32_1 = arith.constant 0 : i32
    return %arg0, %arg1, %c0_i32, %c0_i32_0 : i32, i32, i32, i32
  }
  func.func @transform_17(%arg0: i32, %arg1: i32) -> (i32, i32, i32, i32) {
    %c0_i32 = arith.constant 0 : i32
    %c0_i32_0 = arith.constant 0 : i32
    %c0_i32_1 = arith.constant 0 : i32
    return %arg0, %arg1, %c0_i32, %c0_i32_0 : i32, i32, i32, i32
  }
}

</mosaic_0001>

<bundles_post_ra>
// kernel: concept_centric_transformer_swin_sa_forward.1
= control target key start
LH: loop header
LB: loop body
LE: loop exit
PB: predicated region body
PF: predicated region fallthrough
CT: control target
= control target key end

     0   :  { %s4596_s0 = inlined_call_operand.vmem [shape: f32[2,16,32], index: 0, kind: input, shape index: {}]   ;;  %s4597_s1 = inlined_call_operand.vmem [shape: f32[3,6,32], index: 1, kind: input, shape index: {}]   ;;  %s4598_s2 = inlined_call_operand.vmem [shape: f32[3,32,64], index: 2, kind: input, shape index: {}]   ;;  %s4599_s3 = inlined_call_operand.hbm [shape: f32[3,32,32], index: 3, kind: input, shape index: {}]   ;;  %s4600_s4 = inlined_call_operand.hbm [shape: f32[3,8,32], index: 4, kind: input, shape index: {}]   ;;  %s4601_s5 = inlined_call_operand.hbm [shape: f32[3,32,96], index: 5, kind: input, shape index: {}]   ;;  %s4602_s6 = inlined_call_operand.hbm [shape: f32[3,32,96], index: 6, kind: input, shape index: {}]   ;;  %s4603_s7 = inlined_call_operand.hbm [shape: f32[3,2,96], index: 7, kind: input, shape index: {}]   ;;  %s4604_s8 = inlined_call_operand.hbm [shape: f32[3,32,32], index: 8, kind: input, shape index: {}]   ;;  %s4605_s9 = inlined_call_operand.hbm [shape: f32[3,32,32], index: 9, kind: input, shape index: {}]   ;;  %s4606_s10 = inlined_call_operand.hbm [shape: f32[3,2,32], index: 10, kind: input, shape index: {}]   ;;  %s4607_s11 = inlined_call_operand.hbm [shape: f32[3,8,32], index: 11, kind: input, shape index: {}]   ;;  %s4608_s12 = inlined_call_operand.hbm [shape: f32[3,32,32], index: 12, kind: input, shape index: {}]   ;;  %s4609_s13 = inlined_call_operand.hbm [shape: f32[3,32,64], index: 13, kind: input, shape index: {}]   ;;  %s4610_s14 = inlined_call_operand.vmem [shape: f32[3,32,10], index: 14, kind: input, shape index: {}]   ;;  %s4611_s15 = inlined_call_operand.vmem [shape: f32[3,1,10], index: 15, kind: input, shape index: {}]   ;;  %s4612_s16 = inlined_call_operand.vmem [shape: f32[3,2,16,8], index: 16, kind: output, shape index: {0}]   ;;  %s4613_s17 = inlined_call_operand.vmem [shape: f32[3,2,1,10], index: 17, kind: output, shape index: {1}]  }
   0x1   :  { %4631 = sst [smem:[#allocation36_spill]] %s4596_s0 }
   0x2   :  { %4632 = sst [smem:[#allocation37_spill]] %s4597_s1 }
   0x3   :  { %4633 = sst [smem:[#allocation38_spill]] %s4598_s2 }
   0x4   :  { %4634 = sst [smem:[#allocation39_spill]] %s4599_s3 }
   0x5   :  { %4635 = sst [smem:[#allocation40_spill]] %s4600_s4 }
   0x6   :  { %4636 = sst [smem:[#allocation41_spill]] %s4602_s6 }
   0x7   :  { %4637 = sst [smem:[#allocation42_spill]] %s4604_s8 }
   0x8   :  { %4638 = sst [smem:[#allocation43_spill]] %s4607_s11 }
   0x9   :  { %4639 = sst [smem:[#allocation44_spill]] %s4609_s13 }
   0xa   :  { %4640 = sst [smem:[#allocation45_spill]] %s4610_s14 }
   0xb   :  { %4641 = sst [smem:[#allocation46_spill]] %s4611_s15 }
   0xc   :  { %4642 = sst [smem:[#allocation47_spill]] %s4612_s16 }
   0xd   :  { %4643 = sst [smem:[#allocation48_spill]] %s4613_s17 }
   0xe   :  { %23 = vsyncpa [#allocation3], 0 }
   0xf   :  { %25 = vsyncpa [#allocation3 + $0x1], 0 }
  0x10   :  { %26 = vsyncpa [#allocation5], 0 }
  0x11   :  { %28 = vsyncpa [#allocation5 + $0x1], 0 }
  0x12   :  { %29 = vsyncpa [#allocation8], 0 }
  0x13   :  { %31 = vsyncpa [#allocation8 + $0x1], 0 }
  0x14   :  { %32 = vsyncpa [#allocation11], 0 }
  0x15   :  { %34 = vsyncpa [#allocation11 + $0x1], 0 }
  0x16   :  { %35 = vsyncpa [#allocation14], 0 }
  0x17   :  { %37 = vsyncpa [#allocation14 + $0x1], 0 }
  0x18   :  { %38 = vsyncpa [#allocation17], 0 }
  0x19   :  { %40 = vsyncpa [#allocation17 + $0x1], 0  ;;  %s3993_s24 = smov 0   ;;  %s3995_s25 = smov 0  }
  0x1a   :  { %s3997_s26 = smov 0   ;;  %s3999_s27 = smov 0  }
  0x1b   :  { %s4001_s28 = smov 0   ;;  %s4003_s29 = smov 0  }
  0x1c   :  { %s4005_s0 = smov 0   ;;  %s4007_s30 = smov 0  }
  0x1d LB: > { %4644 = sst [smem:[#allocation25_spill]] %s3857_s25  ;;  %s4614_s18 = sadd.s32 4294967295, %s3881_s30   ;;  %s3881_s30 = sphi %s4007_s30, %s46_s30   ;;  %s3877_s0 = sphi %s4005_s0, %s4693_s0   ;;  %s3873_s29 = sphi %s4003_s29, %s4690_s29   ;;  %s3869_s28 = sphi %s4001_s28, %s4692_s28   ;;  %s3865_s27 = sphi %s3999_s27, %s4689_s27   ;;  %s3861_s26 = sphi %s3997_s26, %s4688_s26   ;;  %s3857_s25 = sphi %s3995_s25, %s4687_s25   ;;  %s3853_s24 = sphi %s3993_s24, %s4686_s24  }
  0x1e   : > { %4645 = sst [smem:[#allocation26_spill]] %s3861_s26  ;;  %s55_s19 = sadd.s32 1, %s3873_s29 }
  0x1f   : > { %4646 = sst [smem:[#allocation27_spill]] %s3865_s27  ;;  %p56_p0 = scmp.ge.s32.totalorder %s55_s19, 2 }
  0x20   : > { %4647 = sst [smem:[#allocation28_spill]] %s3869_s28  ;;  %s58_s1 = sadd.s32 1, %s3877_s0 }
  0x21   : > { %4648 = sst [smem:[#allocation29_spill]] %s3873_s29  ;;  %s143_s20 = sadd.s32 1, %s3861_s26 }
  0x22   : > { %4649 = sst [smem:[#allocation30_spill]] %s3881_s30  ;;  %p150_p1 = scmp.ne.s32.totalorder %s3861_s26, %s3857_s25 }
  0x23   : > { %s4695_s19 = smov (%p56_p0, %s55_s19), 0  ;;  %s4697_s1 = smov (!%p56_p0, %s58_s1), %s3877_s0 }
  0x24   : > { %4650 = sst [smem:[#allocation31_spill]] %s4695_s19  ;;  %p151_p2 = scmp.eq.s32.totalorder %s3881_s30, 0 }
  0x25   : > { %p156_p3 = scmp.ne.s32.totalorder %s3857_s25, %s3853_s24  ;;  %p60_p4 = scmp.ge.s32.totalorder %s4697_s1, 3 }
  0x26   : > { %p157_p5 = scmp.eq.s32.totalorder %s4614_s18, 0  ;;  %p152_p6 = por %p151_p2, %p150_p1 }
  0x27   : > { %s4699_s1 = smov (%p60_p4, %s4697_s1), 0  ;;  %p3377_p8 = scmp.lt.s32.totalorder %s3881_s30, 6 }
  0x28   : > { %4651 = sst [smem:[#allocation32_spill]] %s4699_s1  ;;  %p4046_p7 = por %p157_p5, %p156_p3 }
  0x29   : > { %s140_s22 = ssub.s32 %s3877_s0, %s4699_s1  ;;  %s4054_s23 = sand.u32 1, %s3861_s26  }
  0x2a   : > { %s4652_s21 = scalar_select %p4046_p7, 1, 0 }
  0x2b   : > { %p141_p9 = scmp.eq.s32.totalorder %s140_s22, 0  ;;  %s4057_s24 = sshll.u32 %s4054_s23, 5 }
  0x2c   : > { %4653 = sst [smem:[#allocation33_spill]] %s4652_s21  ;;  %p4059_p10 = pnand %p3377_p8, %p152_p6 }
  0x2d   : > { %s4064_s19 = sand.u32 1, %s3881_s30   ;;  %s4622_s17 = sshll.u32 %s4054_s23, 3 }
  0x2e   : > { %s4067_s29 = scalar_select %p141_p9, %s3861_s26, %s143_s20  }
  0x2f   : > { %s3036_s1 = sshll.u32 %s3877_s0, 7  ;;  %s4656_s4 = sld [smem:[#allocation40_spill]] }
  0x30   : > { %4655 = sst [smem:[#allocation34_spill]] %s4067_s29  ;;  %s596_s22 = scalar_lea.vmem [#allocation4], %s4622_s17 }
  0x31   : > { %s603_s2 = sshll.u32 %s596_s22, 4  ;;  %s4657_s11 = sld [smem:[#allocation43_spill]]  ;;  %s604_s2 = int_to_ptr.vmem [resolvable:$true] %s603_s2 }
  0x32   : > { %s4623_s25 = scalar_lea.sflag [#allocation5], %s4064_s19  ;;  %p4084_p11 = pneg %p4059_p10 }
  0x33   : > { %s3500_s29 = scalar_lea.vmem %s604_s2, 128  ;;  %s3883_s15 = smov [#allocation4]  }
  0x34   : > { %p3501_p12 = scmp.ne.s32.totalorder %s604_s2, %s3500_s29  ;;  %s3505_s16 = sshll.u32 %s3883_s15, 4  ;;  %s3506_s16 = int_to_ptr.vmem [resolvable:$false] %s3505_s16 }
  0x35   : > { %s601_s14 = scalar_lea.hbm %s4656_s4, %s3036_s1  ;;  %s3507_s22 = scalar_lea.vmem %s3506_s16, 256 }
  0x36   : > { %p3503_p13 = pnand %p3501_p12, %p4084_p11  ;;  %p3508_p1 = scmp.lt.s32.totalorder %s604_s2, %s3506_s16 }
  0x37   : > { %s4079_s21 = scalar_lea.hbm %s4657_s11, %s3036_s1  ;;  %p3509_p2 = scmp.lt.s32.totalorder %s3507_s22, %s3500_s29 }
  0x38   : > { %p3504_p0 = pneg %p3503_p13 }
  0x39   : > { %p3510_p3 = por %p3509_p2, %p3508_p1 }
  0x3b   : > { %p3511_p4 = pnand %p3510_p3, %p3504_p0 }
  0x3d   : > { %3514 = shalt.err (!%p3511_p4)
}
  0x3e   : > { %3349 = dma.hbm_to_vmem [thread:$0]  (!%p4059_p10), %s601_s14, 128, %s604_s2, %s4623_s25  }
  0x3f   : > { %p3061_p5 = scmp.ge.s32.totalorder %s3881_s30, 1  ;;  %p802_p6 = scmp.lt.s32.totalorder %s3881_s30, 7 }
  0x40   : > { %s4097_s27 = sshll.u32 %s3877_s0, 9  ;;  %s4661_s6 = sld [smem:[#allocation41_spill]] }
  0x41   : > { %p4099_p8 = pnand %p3061_p5, %p802_p6  ;;  %s635_s16 = scalar_lea.vmem [#allocation7], %s4057_s24 }
  0x42   : > { %s642_s22 = sshll.u32 %s635_s16, 4  ;;  %s4627_s17 = scalar_lea.sflag [#allocation8], %s4064_s19  ;;  %s643_s22 = int_to_ptr.vmem [resolvable:$true] %s642_s22 }
  0x43   : > { %s4659_s28 = scalar_select %p4099_p8, 1, 0 }
  0x44   : > { %s3528_s4 = scalar_lea.vmem %s643_s22, 512  ;;  %s3884_s2 = smov [#allocation7]  }
  0x45   : > { %4660 = sst [smem:[#allocation35_spill]] %s4659_s28  ;;  %p3529_p9 = scmp.ne.s32.totalorder %s643_s22, %s3528_s4 }
  0x46   : > { %s641_s15 = scalar_lea.hbm %s4661_s6, %s4097_s27  ;;  %s3533_s14 = sshll.u32 %s3884_s2, 4  ;;  %s3534_s14 = int_to_ptr.vmem [resolvable:$false] %s3533_s14 }
  0x47   : > { %p3531_p12 = pnand %p3529_p9, %p4084_p11  ;;  %s3535_s25 = scalar_lea.vmem %s3534_s14, 1024 }
  0x48   : > { %p3536_p0 = scmp.lt.s32.totalorder %s643_s22, %s3534_s14  ;;  %p3537_p1 = scmp.lt.s32.totalorder %s3535_s25, %s3528_s4 }
  0x49   : > { %p3532_p13 = pneg %p3531_p12 }
  0x4a   : > { %p3538_p2 = por %p3537_p1, %p3536_p0 }
  0x4c   : > { %p3539_p3 = pnand %p3538_p2, %p3532_p13 }
  0x4e   : > { %3542 = shalt.err (!%p3539_p3)
}
  0x4f   : > { %s3885_s29 = smov 128   ;;  %s3886_s1 = smov 8  }
  0x50   : > { %3355 = dma.hbm_to_vmem [thread:$0]  (!%p4059_p10), %s641_s15, 512, %s643_s22, %s4627_s17, %s3885_s29, %s3885_s29, %s3886_s1  }
  0x51   : > { %s4662_s8 = sld [smem:[#allocation42_spill]]  ;;  %s674_s2 = scalar_lea.vmem [#allocation10], %s4057_s24 }
  0x52   : > { %s681_s14 = sshll.u32 %s674_s2, 4  ;;  %s3043_s6 = sshll.u32 %s4054_s23, 1  ;;  %s682_s14 = int_to_ptr.vmem [resolvable:$true] %s681_s14 }
  0x53   : > { %s4628_s11 = scalar_lea.sflag [#allocation11], %s4064_s19  ;;  %s3556_s26 = scalar_lea.vmem %s682_s14, 512 }
  0x54   : > { %p3557_p4 = scmp.ne.s32.totalorder %s682_s14, %s3556_s26  ;;  %s3887_s30 = smov [#allocation10]  }
  0x55   : > { %s3561_s28 = sshll.u32 %s3887_s30, 4  ;;  %s3562_s28 = int_to_ptr.vmem [resolvable:$false] %s3561_s28 }
  0x56   : > { %p3559_p5 = pnand %p3557_p4, %p4084_p11  ;;  %s3563_s13 = scalar_lea.vmem %s3562_s28, 1024 }
  0x57   : > { %s680_s25 = scalar_lea.hbm %s4662_s8, %s4097_s27  ;;  %p3564_p9 = scmp.lt.s32.totalorder %s682_s14, %s3562_s28 }
  0x58   : > { %p3560_p6 = pneg %p3559_p5  ;;  %p3565_p12 = scmp.lt.s32.totalorder %s3563_s13, %s3556_s26 }
  0x5a   : > { %p3566_p13 = por %p3565_p12, %p3564_p9 }
  0x5c   : > { %p3567_p0 = pnand %p3566_p13, %p3560_p6 }
  0x5e   : > { %3570 = shalt.err (!%p3567_p0)
}
  0x5f   : > { %3361 = dma.hbm_to_vmem [thread:$0]  (!%p4059_p10), %s680_s25, 512, %s682_s14, %s4628_s11, %s3885_s29, %s3885_s29, %s3886_s1  }
  0x60   : > { %s3044_s30 = sshll.u32 %s3877_s0, 5  ;;  %s716_s4 = scalar_lea.vmem [#allocation13], %s3043_s6 }
  0x61   : > { %s4138_s13 = scalar_lea.hbm %s4603_s7, %s3044_s30  ;;  %s721_s16 = scalar_lea.hbm %s4606_s10, %s3044_s30 }
  0x62   : > { %s723_s2 = sshll.u32 %s716_s4, 4  ;;  %s4629_s17 = scalar_lea.sflag [#allocation14], %s4064_s19  ;;  %s724_s2 = int_to_ptr.vmem [resolvable:$true] %s723_s2 }
  0x63   : > { %s3584_s8 = scalar_lea.vmem %s724_s2, 32  ;;  %s3888_s25 = smov [#allocation13]  }
  0x64   : > { %p3585_p1 = scmp.ne.s32.totalorder %s724_s2, %s3584_s8  ;;  %s3589_s14 = sshll.u32 %s3888_s25, 4  ;;  %s3590_s14 = int_to_ptr.vmem [resolvable:$false] %s3589_s14 }
  0x65   : > { %s3591_s15 = scalar_lea.vmem %s3590_s14, 64  ;;  %p3592_p4 = scmp.lt.s32.totalorder %s724_s2, %s3590_s14 }
  0x66   : > { %p3587_p2 = pnand %p3585_p1, %p4084_p11  ;;  %p3593_p5 = scmp.lt.s32.totalorder %s3591_s15, %s3584_s8 }
  0x68   : > { %p3588_p3 = pneg %p3587_p2  ;;  %p3594_p6 = por %p3593_p5, %p3592_p4 }
  0x6a   : > { %p3595_p9 = pnand %p3594_p6, %p3588_p3 }
  0x6c   : > { %3598 = shalt.err (!%p3595_p9)
}
  0x6d   : > { %3367 = dma.hbm_to_vmem [thread:$0]  (!%p4059_p10), %s721_s16, 32, %s724_s2, %s4629_s17  }
  0x6e   : > { %s758_s26 = scalar_lea.hbm %s4608_s12, %s4097_s27  ;;  %s752_s28 = scalar_lea.vmem [#allocation16], %s4057_s24 }
  0x6f   : > { %s759_s4 = sshll.u32 %s752_s28, 4  ;;  %s4630_s8 = scalar_lea.sflag [#allocation17], %s4064_s19  ;;  %s760_s4 = int_to_ptr.vmem [resolvable:$true] %s759_s4 }
  0x70   : > { %s3612_s25 = scalar_lea.vmem %s760_s4, 512  ;;  %s3889_s14 = smov [#allocation16]  }
  0x71   : > { %p3613_p12 = scmp.ne.s32.totalorder %s760_s4, %s3612_s25  ;;  %s3617_s15 = sshll.u32 %s3889_s14, 4  ;;  %s3618_s15 = int_to_ptr.vmem [resolvable:$false] %s3617_s15 }
  0x72   : > { %s3619_s11 = scalar_lea.vmem %s3618_s15, 1024  ;;  %p3620_p1 = scmp.lt.s32.totalorder %s760_s4, %s3618_s15 }
  0x73   : > { %p3615_p13 = pnand %p3613_p12, %p4084_p11  ;;  %p3621_p2 = scmp.lt.s32.totalorder %s3619_s11, %s3612_s25 }
  0x75   : > { %p3616_p0 = pneg %p3615_p13  ;;  %p3622_p3 = por %p3621_p2, %p3620_p1 }
  0x77   : > { %p3623_p4 = pnand %p3622_p3, %p3616_p0 }
  0x79   : > { %3626 = shalt.err (!%p3623_p4)
}
  0x7a   : > { %3373 = dma.hbm_to_vmem [thread:$0]  (!%p4059_p10), %s758_s26, 512, %s760_s4, %s4630_s8, %s3885_s29, %s3885_s29, %s3886_s1  }
  0x7b   : > { %s4663_s3 = sld [smem:[#allocation39_spill]]  ;;  %s575_s11 = scalar_lea.vmem [#allocation2], %s4057_s24 }
  0x7c   : > { %s582_s22 = sshll.u32 %s575_s11, 4  ;;  %s572_s28 = scalar_lea.sflag [#allocation3], %s4054_s23  ;;  %s583_s22 = int_to_ptr.vmem [resolvable:$true] %s582_s22 }
  0x7d   : > { %s3640_s25 = scalar_lea.vmem %s583_s22, 512  ;;  %s3890_s14 = smov [#allocation2]  }
  0x7e   : > { %p3641_p5 = scmp.ne.s32.totalorder %s583_s22, %s3640_s25  ;;  %s3645_s15 = sshll.u32 %s3890_s14, 4  ;;  %s3646_s15 = int_to_ptr.vmem [resolvable:$false] %s3645_s15 }
  0x7f   : > { %s3647_s17 = scalar_lea.vmem %s3646_s15, 1024  ;;  %p3648_p12 = scmp.lt.s32.totalorder %s583_s22, %s3646_s15 }
  0x80   : > { %p3643_p6 = pnand %p3641_p5, %p4084_p11  ;;  %p3649_p13 = scmp.lt.s32.totalorder %s3647_s17, %s3640_s25 }
  0x81   : > { %s581_s30 = scalar_lea.hbm %s4663_s3, %s4097_s27 }
  0x82   : > { %p3644_p9 = pneg %p3643_p6  ;;  %p3650_p0 = por %p3649_p13, %p3648_p12 }
  0x84   : > { %p3651_p1 = pnand %p3650_p0, %p3644_p9 }
  0x86   : > { %3654 = shalt.err (!%p3651_p1)
}
  0x87   : > { %3346 = dma.hbm_to_vmem [thread:$0]  (!%p4059_p10), %s581_s30, 512, %s583_s22, %s572_s28, %s3885_s29, %s3885_s29, %s3886_s1  }
  0x88   : > { %s620_s16 = scalar_lea.hbm %s4601_s5, %s4097_s27  ;;  %s614_s2 = scalar_lea.vmem [#allocation6], %s4057_s24 }
  0x89   : > { %s621_s11 = sshll.u32 %s614_s2, 4  ;;  %s656_s17 = scalar_lea.vmem [#allocation9], %s3043_s6  ;;  %s622_s11 = int_to_ptr.vmem [resolvable:$true] %s621_s11 }
  0x8a   : > { %s663_s25 = sshll.u32 %s656_s17, 4  ;;  %s3668_s14 = scalar_lea.vmem %s622_s11, 512  ;;  %s664_s25 = int_to_ptr.vmem [resolvable:$true] %s663_s25 }
  0x8b   : > { %p3669_p2 = scmp.ne.s32.totalorder %s622_s11, %s3668_s14  ;;  %s3891_s15 = smov [#allocation6]  }
  0x8c   : > { %s3673_s8 = sshll.u32 %s3891_s15, 4  ;;  %s3674_s8 = int_to_ptr.vmem [resolvable:$false] %s3673_s8 }
  0x8d   : > { %p3671_p3 = pnand %p3669_p2, %p4084_p11  ;;  %s3675_s3 = scalar_lea.vmem %s3674_s8, 1024 }
  0x8e   : > { %p3676_p5 = scmp.lt.s32.totalorder %s622_s11, %s3674_s8  ;;  %p3677_p6 = scmp.lt.s32.totalorder %s3675_s3, %s3668_s14 }
  0x8f   : > { %p3672_p4 = pneg %p3671_p3 }
  0x90   : > { %p3678_p9 = por %p3677_p6, %p3676_p5 }
  0x92   : > { %p3679_p12 = pnand %p3678_p9, %p3672_p4 }
  0x94   : > { %3682 = shalt.err (!%p3679_p12)
}
  0x95   : > { %s4664_s6 = scalar_lea.sflag [#allocation5], %s4064_s19  ;;  %s3696_s30 = scalar_lea.vmem %s664_s25, 32 }
  0x96   : > { %3352 = dma.hbm_to_vmem [thread:$0]  (!%p4059_p10), %s620_s16, 512, %s622_s11, %s4664_s6, %s3885_s29, %s3885_s29, %s3886_s1  }
  0x97   : > { %p3697_p13 = scmp.ne.s32.totalorder %s664_s25, %s3696_s30  ;;  %s3892_s8 = smov [#allocation9]  }
  0x98   : > { %s3701_s3 = sshll.u32 %s3892_s8, 4  ;;  %s3702_s3 = int_to_ptr.vmem [resolvable:$false] %s3701_s3 }
  0x99   : > { %p3699_p0 = pnand %p3697_p13, %p4084_p11  ;;  %s3703_s22 = scalar_lea.vmem %s3702_s3, 64 }
  0x9a   : > { %p3704_p2 = scmp.lt.s32.totalorder %s664_s25, %s3702_s3  ;;  %p3705_p3 = scmp.lt.s32.totalorder %s3703_s22, %s3696_s30 }
  0x9b   : > { %p3700_p1 = pneg %p3699_p0 }
  0x9c   : > { %p3706_p4 = por %p3705_p3, %p3704_p2 }
  0x9e   : > { %p3707_p5 = pnand %p3706_p4, %p3700_p1 }
  0xa0   : > { %3710 = shalt.err (!%p3707_p5)
}
  0xa1   : > { %s4665_s28 = scalar_lea.sflag [#allocation8], %s4064_s19  ;;  %s701_s16 = scalar_lea.hbm %s4605_s9, %s4097_s27 }
  0xa2   : > { %3358 = dma.hbm_to_vmem [thread:$0]  (!%p4059_p10), %s4138_s13, 32, %s664_s25, %s4665_s28  }
  0xa3   : > { %s695_s2 = scalar_lea.vmem [#allocation12], %s4057_s24  ;;  %s4666_s17 = sshll.u32 %s4054_s23, 3 }
  0xa4   : > { %s702_s11 = sshll.u32 %s695_s2, 4  ;;  %s734_s14 = scalar_lea.vmem [#allocation15], %s4666_s17  ;;  %s703_s11 = int_to_ptr.vmem [resolvable:$true] %s702_s11 }
  0xa5   : > { %s741_s15 = sshll.u32 %s734_s14, 4  ;;  %s3724_s6 = scalar_lea.vmem %s703_s11, 512  ;;  %s742_s15 = int_to_ptr.vmem [resolvable:$true] %s741_s15 }
  0xa6   : > { %p3725_p6 = scmp.ne.s32.totalorder %s703_s11, %s3724_s6  ;;  %s3893_s30 = smov [#allocation12]  }
  0xa7   : > { %s3729_s8 = sshll.u32 %s3893_s30, 4  ;;  %s3730_s8 = int_to_ptr.vmem [resolvable:$false] %s3729_s8 }
  0xa8   : > { %p3727_p9 = pnand %p3725_p6, %p4084_p11  ;;  %s3731_s3 = scalar_lea.vmem %s3730_s8, 1024 }
  0xa9   : > { %p3732_p13 = scmp.lt.s32.totalorder %s703_s11, %s3730_s8  ;;  %p3733_p0 = scmp.lt.s32.totalorder %s3731_s3, %s3724_s6 }
  0xaa   : > { %p3728_p12 = pneg %p3727_p9 }
  0xab   : > { %p3734_p1 = por %p3733_p0, %p3732_p13 }
  0xad   : > { %p3735_p2 = pnand %p3734_p1, %p3728_p12 }
  0xaf   : > { %3738 = shalt.err (!%p3735_p2)
}
  0xb0   : > { %s4667_s23 = scalar_lea.sflag [#allocation11], %s4064_s19  ;;  %s3752_s13 = scalar_lea.vmem %s742_s15, 128 }
  0xb1   : > { %3364 = dma.hbm_to_vmem [thread:$0]  (!%p4059_p10), %s701_s16, 512, %s703_s11, %s4667_s23, %s3885_s29, %s3885_s29, %s3886_s1  }
  0xb2   : > { %p3753_p3 = scmp.ne.s32.totalorder %s742_s15, %s3752_s13  ;;  %s3894_s25 = smov [#allocation15]  }
  0xb3   : > { %s3757_s22 = sshll.u32 %s3894_s25, 4  ;;  %s3758_s22 = int_to_ptr.vmem [resolvable:$false] %s3757_s22 }
  0xb4   : > { %p3755_p4 = pnand %p3753_p3, %p4084_p11  ;;  %s3759_s28 = scalar_lea.vmem %s3758_s22, 256 }
  0xb5   : > { %p3760_p6 = scmp.lt.s32.totalorder %s742_s15, %s3758_s22  ;;  %p3761_p9 = scmp.lt.s32.totalorder %s3759_s28, %s3752_s13 }
  0xb6   : > { %p3756_p5 = pneg %p3755_p4 }
  0xb7   : > { %p3762_p12 = por %p3761_p9, %p3760_p6 }
  0xb9   : > { %p3763_p13 = pnand %p3762_p12, %p3756_p5 }
  0xbb   : > { %3766 = shalt.err (!%p3763_p13)
}
  0xbc   : > { %s4668_s26 = scalar_lea.sflag [#allocation14], %s4064_s19  ;;  %s4669_s2 = sld [smem:[#allocation44_spill]] }
  0xbd   : > { %3370 = dma.hbm_to_vmem [thread:$0]  (!%p4059_p10), %s4079_s21, 128, %s742_s15, %s4668_s26  }
  0xbe   : > { %s773_s17 = scalar_lea.vmem [#allocation18], %s4057_s24  ;;  %s3895_s30 = smov [#allocation18]  }
  0xbf   : > { %s780_s14 = sshll.u32 %s773_s17, 4  ;;  %s3785_s8 = sshll.u32 %s3895_s30, 4  ;;  %s781_s14 = int_to_ptr.vmem [resolvable:$true] %s780_s14  ;;  %s3786_s8 = int_to_ptr.vmem [resolvable:$false] %s3785_s8 }
  0xc0   : > { %s3780_s6 = scalar_lea.vmem %s781_s14, 512  ;;  %s3787_s3 = scalar_lea.vmem %s3786_s8, 1024 }
  0xc1   : > { %p3781_p0 = scmp.ne.s32.totalorder %s781_s14, %s3780_s6  ;;  %p3788_p3 = scmp.lt.s32.totalorder %s781_s14, %s3786_s8 }
  0xc2   : > { %s779_s11 = scalar_lea.hbm %s4669_s2, %s4097_s27  ;;  %p3789_p4 = scmp.lt.s32.totalorder %s3787_s3, %s3780_s6 }
  0xc3   : > { %p3783_p1 = pnand %p3781_p0, %p4084_p11 }
  0xc4   : > { %p3790_p5 = por %p3789_p4, %p3788_p3 }
  0xc5   : > { %p3784_p2 = pneg %p3783_p1 }
  0xc7   : > { %p3791_p6 = pnand %p3790_p5, %p3784_p2 }
  0xc9   : > { %3794 = shalt.err (!%p3791_p6)
}
  0xca   : > { %s4670_s21 = scalar_lea.sflag [#allocation17], %s4064_s19  ;;  %806 = sbr.rel (%p4099_p8) target bundleno = 4776 (0x12a8), region = 84 }
  0xcb   : > { %3376 = dma.hbm_to_vmem [thread:$0]  (!%p4059_p10), %s779_s11, 512, %s781_s14, %s4670_s21, %s3885_s29, %s3885_s29, %s3886_s1  }
  0xcc   : > { %s4672_s20 = sld [smem:[#allocation25_spill]] (!%p4099_p8) }
  0xd2   : > { %s808_s15 = sand.u32 1, %s4672_s20  }
  0xd3   : > { %s4243_s23 = sshll.u32 %s808_s15, 5  ;;  %s809_s13 = scalar_lea.sflag [#allocation3], %s808_s15 }
  0xd4   : > { %s4246_s25 = scalar_lea.vmem [#allocation2], %s4243_s23 }
  0xd5   : > { %3828 = dma.done.wait (%p4046_p7), %s809_s13, 512  }
  0xd6   : > { %3830 = vsyncadd (%p4046_p7), %s809_s13, 4294966784  ;;  %s4674_s18 = sld [smem:[#allocation30_spill]]  ;;  %s3063_s1 = sshll.u32 %s808_s15, 3 }
  0xd7   : > { %s4254_s28 = scalar_lea.vmem [#allocation4], %s3063_s1 }
  0xdc   : > { %s4675_s19 = sadd.s32 4294967295, %s4674_s18  }
  0xdd   : > { %s817_s29 = sand.u32 1, %s4675_s19  }
  0xde   : > { %s818_s22 = scalar_lea.sflag [#allocation5], %s817_s29 }
  0xdf   : > { %3832 = dma.done.wait (%p4046_p7), %s818_s22, 640  }
  0xe0   : > { %3834 = vsyncadd (%p4046_p7), %s818_s22, 4294966656  ;;  %s4261_s26 = scalar_lea.vmem [#allocation6], %s4243_s23  ;;  %s836_s4 = scalar_lea.sflag [#allocation8], %s817_s29 }
  0xe1   : > { %s4264_s16 = scalar_lea.vmem [#allocation7], %s4243_s23 }
  0xe2   : > { %3836 = dma.done.wait (%p4046_p7), %s836_s4, 544  }
  0xe3   : > { %3838 = vsyncadd (%p4046_p7), %s836_s4, 4294966752  ;;  %s3066_s2 = sshll.u32 %s808_s15, 1  ;;  %s854_s17 = scalar_lea.sflag [#allocation11], %s817_s29 }
  0xe4   : > { %s4270_s11 = scalar_lea.vmem [#allocation9], %s3066_s2  ;;  %s4273_s14 = scalar_lea.vmem [#allocation10], %s4243_s23 }
  0xe5   : > { %3840 = dma.done.wait (%p4046_p7), %s854_s17, 1024  }
  0xe6   : > { %3842 = vsyncadd (%p4046_p7), %s854_s17, 4294966272  ;;  %s4280_s6 = scalar_lea.vmem [#allocation12], %s4243_s23  ;;  %s872_s30 = scalar_lea.sflag [#allocation14], %s817_s29 }
  0xe7   : > { %s4282_s8 = scalar_lea.vmem [#allocation13], %s3066_s2 }
  0xe8   : > { %3844 = dma.done.wait (%p4046_p7), %s872_s30, 160  }
  0xe9   : > { %3846 = vsyncadd (%p4046_p7), %s872_s30, 4294967136  ;;  %s4288_s3 = scalar_lea.vmem [#allocation15], %s3063_s1  ;;  %s890_s21 = scalar_lea.sflag [#allocation17], %s817_s29 }
  0xea   : > { %s4291_s24 = scalar_lea.vmem [#allocation16], %s4243_s23 }
  0xeb   : > { %3848 = dma.done.wait (%p4046_p7), %s890_s21, 1024  }
  0xec   : > { %3850 = vsyncadd (%p4046_p7), %s890_s21, 4294966272  ;;  %s4676_s20 = sld [smem:[#allocation27_spill]]  ;;  %vm1077_vm0 = vcmask 261120   ;;  %v4308_v1 = vld [vmem:[%s4254_s28] sm:$0xff]  ;;  %v1233_v21 = vld [vmem:[%s4246_s25 + $0x18] sm:$0xff]  ;;  %v3896_v22 = vmov 0.0   ;;  %v1105_v37 = vlaneseq }
  0xed   : > { %s4677_s19 = sld [smem:[#allocation36_spill]]  ;;  %v1207_v4 = vsel %vm1077_vm0, %v4308_v1, 0.0  ;;  %3196 = vmatprep.subr.mxu1 %v3896_v22  ;;  %v1232_v23 = vld [vmem:[%s4246_s25 + $0x10] sm:$0xff]  ;;  %v1231_v27 = vld [vmem:[%s4246_s25 + $0x8] sm:$0xff]  ;;  %v1230_v29 = vld [vmem:[%s4246_s25] sm:$0xff]  ;;  %vm3897_vm1 = vmmov 0  }
  0xee   : > { %1208 = vadd.xlane.f32.xlu1 %v1207_v4  ;;  %s4678_s27 = sld [smem:[#allocation28_spill]]  ;;  %3197 = vmatpush3.msra.mxu1 %v1233_v21  ;;  %v4359_v40 = vshrl.u32 %v1105_v37, 7  ;;  %s3898_s13 = smov 96   ;;  %vm1386_vm2 = vcmask 130048   ;;  %vm2154_vm3 = vcmask 64512   ;;  %vm2615_vm4 = vcmask 73728  }
  0xef   : > { %s4679_s4 = sld [smem:[#allocation38_spill]]  ;;  %3198 = vmatprep.subr.mxu1 %v3896_v22  ;;  %3204 = vmatprep.mubr.msk.f32.mxu1 %vm3897_vm1, %v3896_v22  ;;  %s3900_s18 = smov 64  }
  0xf0   : > { %3199 = vmatpush3.msra.mxu1 %v1232_v23  ;;  %s4680_s21 = sld [smem:[#allocation37_spill]]  ;;  %v4365_v41 = vsub.s32 0, %v4359_v40  ;;  %v4370_v43 = vsub.s32 1, %v4359_v40  ;;  %v1222_v45 = vsub.s32 2, %v4359_v40  ;;  %v1227_v49 = vsub.s32 3, %v4359_v40 }
  0xf1   : > { %3200 = vmatprep.subr.mxu1 %v3896_v22  ;;  %s4683_s30 = sld [smem:[#allocation46_spill]] }
  0xf2   : > { %p1036_p10 = scmp.lt.s32.totalorder %s4676_s20, 1  ;;  %3201 = vmatpush3.msra.mxu1 %v1231_v27 }
  0xf3   : > { %3202 = vmatprep.subr.mxu1 %v3896_v22 }
  0xf4   : > { %s4701_s20 = smov (!%p1036_p10, %s4676_s20), 1  ;;  %p1041_p7 = scmp.lt.s32.totalorder %s4678_s27, 2  ;;  %3203 = vmatpush3.msra.mxu1 %v1230_v29 }
  0xf5   : > { %s3118_s15 = sshll.u32 %s4701_s20, 4  ;;  %3214 = vmatprep.subr.mxu1 %v3896_v22 }
  0xf6   : > { %s1040_s1 = scalar_lea.vmem %s4677_s19, %s3118_s15  ;;  %s4703_s27 = smov (!%p1041_p7, %s4678_s27), 2 }
  0xf7   : > { %v4305_v0 = vld [vmem:[%s1040_s1] sm:$0xff]  ;;  %v4310_v2 = vld [vmem:[%s1040_s1 + $0x8] sm:$0xff]  ;;  %s3119_s29 = sshll.u32 %s4703_s27, 5  ;;  %s3075_s25 = sshll.u32 %s4703_s27, 3 }
  0xf8   : > { %v1078_v3 = vsel %vm1077_vm0, %v4305_v0, 0.0  ;;  %v1081_v5 = vsel %vm1077_vm0, %v4310_v2, 0.0  ;;  %s1049_s2 = scalar_lea.vmem %s4679_s4, %s3119_s29  ;;  %s1044_s15 = scalar_lea.vmem %s4680_s21, %s3075_s25 }
  0xf9   : > { %1079 = vadd.xlane.f32.xlu0 %v1078_v3  ;;  %v1120_v24 = vld [vmem:[%s1049_s2 + $0x18] sm:$0xff]  ;;  %v1119_v25 = vld [vmem:[%s1049_s2 + $0x10] sm:$0xff]  ;;  %v1118_v26 = vld [vmem:[%s1049_s2 + $0x8] sm:$0xff]  ;;  %s3081_s19 = sshll.u32 %s4703_s27, 2  ;;  %s4682_s4 = sld [smem:[#allocation47_spill]] }
  0xfa   : > { %3185 = vmatprep.subr.mxu0 %v1120_v24  ;;  %v1117_v28 = vld [vmem:[%s1049_s2] sm:$0xff]  ;;  %s1057_s21 = scalar_lea.vmem %s4683_s30, %s4703_s27 }
  0xfb   : > { %3186 = vmatpush3.msra.mxu0 %v1120_v24  ;;  %v4367_v42 = vld [vmem:[%s1044_s15] sm:$0x3f]  ;;  %s3083_s15 = sshll.u32 %s4703_s27, 1 }
  0xfc   : > { %3187 = vmatprep.subr.mxu0 %v1119_v25  ;;  %v1108_v44 = vrot.slane %v4367_v42, %v4365_v41  ;;  %v1114_v48 = vrot.slane %v4367_v42, %v4370_v43  ;;  %v1223_v51 = vrot.slane %v4367_v42, %v1222_v45  ;;  %v1228_v56 = vrot.slane %v4367_v42, %v1227_v49  ;;  %v1495_v45 = vld [vmem:[%s4261_s26 + $0x10] sm:$0xff] }
  0xfd   : > { %1082 = vadd.xlane.f32.xlu0 %v1081_v5  ;;  %3188 = vmatpush3.msra.mxu0 %v1119_v25 }
  0xfe   : > { %3189 = vmatprep.subr.mxu0 %v1118_v26 }
  0xff   : > { %3190 = vmatpush3.msra.mxu0 %v1118_v26 }
 0x100   : > { %3191 = vmatprep.subr.mxu0 %v1117_v28 }
 0x101   : > { %3192 = vmatpush3.msra.mxu0 %v1117_v28 }
 0x102   : > { %3207 = vmatprep.subr.mxu0 %v3896_v22 }
 0x177   : > { %v1209_v7 = vpop.xlane.xlu1 %1208 }
 0x178   : > { %v1210_v9 = vmul.f32 0.03125, %v1209_v7 }
 0x17a   : > { %v4322_v11 = vsub.f32 %v4308_v1, %v1210_v9 }
 0x17c   : > { %v1212_v15 = vmul.f32 %v4322_v11, %v4322_v11 }
 0x17e   : > { %v1213_v18 = vsel %vm1077_vm0, %v1212_v15, 0.0 }
 0x182   : > { %v1080_v6 = vpop.xlane.xlu0 %1079 }
 0x183   : > { %v1085_v8 = vmul.f32 0.03125, %v1080_v6 }
 0x185   : > { %v4319_v10 = vsub.f32 %v4305_v0, %v1085_v8 }
 0x186   : > { %v1083_v12 = vpop.xlane.xlu0 %1082 }
 0x187   : > { %v1086_v13 = vmul.f32 0.03125, %v1083_v12  ;;  %v1089_v14 = vmul.f32 %v4319_v10, %v4319_v10 }
 0x189   : > { %v4329_v16 = vsub.f32 %v4310_v2, %v1086_v13  ;;  %v1091_v17 = vsel %vm1077_vm0, %v1089_v14, 0.0 }
 0x18a   : > { %1092 = vadd.xlane.f32.xlu1 %v1091_v17 }
 0x18b   : > { %v1090_v19 = vmul.f32 %v4329_v16, %v4329_v16 }
 0x18d   : > { %v1094_v20 = vsel %vm1077_vm0, %v1090_v19, 0.0 }
 0x18e   : > { %1214 = vadd.xlane.f32.xlu1 %v1213_v18  ;;  %1095 = vadd.xlane.f32.xlu0 %v1094_v20 }
 0x213   : > { %v1093_v30 = vpop.xlane.xlu1 %1092 }
 0x214   : > { %v1097_v31 = vmul.f32 0.03125, %v1093_v30 }
 0x216   : > { %v1099_v32 = vadd.f32 1e-05, %v1097_v31 }
 0x217   : > { %v1215_v33 = vpop.xlane.xlu1 %1214  ;;  %v1096_v34 = vpop.xlane.xlu0 %1095 }
 0x218   : > { %3451 = vrsqrt.f32 %v1099_v32  ;;  %v1216_v35 = vmul.f32 0.03125, %v1215_v33  ;;  %v1098_v36 = vmul.f32 0.03125, %v1096_v34  ;;  %v1577_v32 = vld [vmem:[%s4264_s16 + $0x18] sm:$0xff]  ;;  %v1576_v33 = vld [vmem:[%s4264_s16 + $0x10] sm:$0xff]  ;;  %v1575_v34 = vld [vmem:[%s4264_s16 + $0x8] sm:$0xff] }
 0x21a   : > { %v1217_v38 = vadd.f32 1e-05, %v1216_v35  ;;  %v1100_v39 = vadd.f32 1e-05, %v1098_v36  ;;  %v1574_v35 = vld [vmem:[%s4264_s16] sm:$0xff]  ;;  %s3899_s16 = smov 32  }
 0x21c   : > { %3453 = vrsqrt.f32 %v1217_v38 }
 0x21d   : > { %3455 = vrsqrt.f32 %v1100_v39 }
 0x225   : > { %v3452_v46 = vpop.eup %3451 }
 0x226   : > { %v1103_v47 = vmul.f32 %v3452_v46, %v4319_v10  ;;  %v1494_v46 = vld [vmem:[%s4261_s26 + $0x8] sm:$0xff] }
 0x228   : > { %v1109_v50 = vmul.f32 %v1108_v44, %v1103_v47  ;;  %v1493_v47 = vld [vmem:[%s4261_s26] sm:$0xff] }
 0x229   : > { %v3454_v52 = vpop.eup %3453 }
 0x22a   : > { %v3456_v53 = vpop.eup %3455  ;;  %v1115_v54 = vadd.f32 %v1114_v48, %v1109_v50  ;;  %v1219_v55 = vmul.f32 %v3454_v52, %v4322_v11 }
 0x22b   : > { %v1104_v57 = vmul.f32 %v3456_v53, %v4329_v16 }
 0x22c   : > { %3193 = vmatprep.mubr.msk.f32.mxu0 %vm1077_vm0, %v1115_v54  ;;  %v1224_v58 = vmul.f32 %v1223_v51, %v1219_v55 }
 0x22d   : > { %v1110_v59 = vmul.f32 %v1108_v44, %v1104_v57  ;;  %v1496_v44 = vld [vmem:[%s4261_s26 + $0x18] sm:$0xff]  ;;  %s902_s26 = scalar_lea.vmem [#allocation18], %s4243_s23  ;;  %s3901_s23 = smov 112  }
 0x22e   : > { %v1229_v60 = vadd.f32 %v1228_v56, %v1224_v58 }
 0x22f   : > { %v1116_v61 = vadd.f32 %v1114_v48, %v1110_v59  ;;  %v1205_v48 = vld [vmem:[%s4270_s11] sm:$0x3] }
 0x230   : > { %3205 = vmatmul.mubr.msk.f32.vlgmr.msra.gmra.mxu1 %vm1077_vm0, %v1229_v60  ;;  %v1581_v49 = vrot.slane %v1205_v48, %v4370_v43  ;;  %v1500_v55 = vrot.slane %v1205_v48, %v4365_v41 }
 0x231   : > { %3194 = vmatmul.mubr.msk.f32.vlgmr.msra.gmra.mxu0 %vm1077_vm0, %v1116_v61  ;;  %3218 = vmatprep.mubr.msk.f32.mxu1 %vm3897_vm1, %v3896_v22 }
 0x232   : > { %3211 = vmatprep.mubr.msk.f32.mxu0 %vm3897_vm1, %v3896_v22 }
 0x2f0   : > { %v1303_v62 = vpop.f32.mrf.mxu1 }
 0x2f1   : > { %v3195_v63 = vpop.f32.mrf.mxu0 }
 0x2f2   : > { %v1203_v3 = vmul.f32 0.17677669, %v3195_v63  ;;  %1416 = vrot.lane.b32.xlu1 %v3195_v63, %s3898_s13  ;;  %v3206_v4 = vpop.f32.mrf.mxu1 }
 0x2f3   : > { %v1193_v5 = vpop.f32.mrf.mxu0 }
 0x2f4   : > { %3208 = vmatpush3.xpose.msk.msra.mxu0 %vm1077_vm0, %v1203_v3  ;;  %v1202_v6 = vmul.f32 0.17677669, %v1193_v5 }
 0x2f5   : > { %3209 = vmatprep.subr.mxu0 %v3896_v22 }
 0x2f8   : > { %3210 = vmatpush3.xpose.msk.msra.mxu0 %vm1077_vm0, %v1202_v6 }
 0x2f9   : > { %3232 = vmatprep.subr.mxu0 %v3896_v22 }
 0x2fb   : > { %3212 = vmatmul.mubr.msk.f32.vlgmr.msra.gmra.mxu0 %vm1077_vm0, %v1303_v62 }
 0x2fc   : > { %3240 = vmatprep.mubr.msk.f32.mxu0 %vm3897_vm1, %v3896_v22  ;;  %3233 = vmatpush3.msra.mxu0 %v1577_v32 }
 0x2fd   : > { %3234 = vmatprep.subr.mxu0 %v3896_v22 }
 0x2fe   : > { %3235 = vmatpush3.msra.mxu0 %v1576_v33 }
 0x2ff   : > { %3236 = vmatprep.subr.mxu0 %v3896_v22 }
 0x300   : > { %3237 = vmatpush3.msra.mxu0 %v1575_v34 }
 0x301   : > { %3238 = vmatprep.subr.mxu0 %v3896_v22 }
 0x302   : > { %3239 = vmatpush3.msra.mxu0 %v1574_v35 }
 0x303   : > { %3241 = vmatmul.mubr.msk.f32.vlgmr.msra.gmra.mxu0 %vm1077_vm0, %v4308_v1  ;;  %3254 = vmatprep.subr.mxu0 %v3896_v22 }
 0x304   : > { %3262 = vmatprep.mubr.msk.f32.mxu0 %vm3897_vm1, %v3896_v22 }
 0x364   : > { %v1417_v7 = vpop.permute.xlu1 %1416 }
 0x365   : > { %3215 = vmatpush3.msra.mxu1 %v1417_v7 }
 0x366   : > { %3216 = vmatprep.subr.mxu1 %v3896_v22 }
 0x3bb   : > { %v1382_v8 = vpop.f32.mrf.mxu0 }
 0x3bc   : > { %v1387_v9 = vsel %vm1386_vm2, %v1382_v8, -inf }
 0x3bd   : > { %v1388_v10 = vrot.slane %v1387_v9, 4  ;;  %v3213_v11 = vpop.f32.mrf.mxu0 }
 0x3bf   : > { %v1389_v12 = vmax.f32 %v1387_v9, %v1388_v10 }
 0x3c1   : > { %v1390_v13 = vrot.slane %v1389_v12, 2 }
 0x3c3   : > { %v1391_v14 = vmax.f32 %v1389_v12, %v1390_v13  ;;  %v1651_v50 = vpop.f32.mrf.mxu0 }
 0x3c4   : > { %v1652_v51 = vadd.f32 %v1651_v50, %v1581_v49 }
 0x3c5   : > { %v1392_v15 = vrot.slane %v1391_v14, 1  ;;  %v3242_v52 = vpop.f32.mrf.mxu0 }
 0x3c6   : > { %1663 = vrot.lane.b32.xlu1 %v1652_v51, %s3900_s18  ;;  %v1902_v52 = vld [vmem:[%s4291_s24 + $0x18] sm:$0xff] }
 0x3c7   : > { %v1393_v16 = vmax.f32 %v1391_v14, %v1392_v15  ;;  %v1707_v15 = vsub.s32 4, %v4359_v40 }
 0x3c9   : > { %v1394_v17 = vsub.f32 %v1382_v8, %v1393_v16  ;;  %v1708_v16 = vrot.slane %v4367_v42, %v1707_v15 }
 0x3cb   : > { %v1395_v18 = vmul.f32 1.442695, %v1394_v17 }
 0x3cd   : > { %3457 = vpow2.f32 %v1395_v18 }
 0x3da   : > { %v3458_v19 = vpop.eup %3457 }
 0x3db   : > { %v1397_v20 = vsel %vm1386_vm2, %v3458_v19, 0.0 }
 0x3dc   : > { %v1398_v21 = vrot.slane %v1397_v20, 4 }
 0x3de   : > { %v1399_v23 = vadd.f32 %v1398_v21, %v1397_v20 }
 0x3e0   : > { %v1400_v24 = vrot.slane %v1399_v23, 2 }
 0x3e2   : > { %v1401_v25 = vadd.f32 %v1400_v24, %v1399_v23  ;;  %v1716_v24 = vsub.s32 5, %v4359_v40 }
 0x3e4   : > { %v1402_v26 = vrot.slane %v1401_v25, 1 }
 0x3e6   : > { %v1403_v27 = vadd.f32 %v1402_v26, %v1401_v25  ;;  %v1717_v25 = vrot.slane %v4367_v42, %v1716_v24  ;;  %v1726_v26 = vld [vmem:[%s4273_s14 + $0x18] sm:$0xff] }
 0x3e8   : > { %3459 = vrcp.f32 %v1403_v27  ;;  %v1725_v27 = vld [vmem:[%s4273_s14 + $0x10] sm:$0xff] }
 0x3f5   : > { %v3460_v28 = vpop.eup %3459 }
 0x3f6   : > { %v1405_v29 = vmul.f32 %v3460_v28, %v3458_v19  ;;  %v1724_v28 = vld [vmem:[%s4273_s14 + $0x8] sm:$0xff] }
 0x3f8   : > { %v1406_v30 = vadd.f32 1e-08, %v1405_v29  ;;  %v1723_v29 = vld [vmem:[%s4273_s14] sm:$0xff] }
 0x3fa   : > { %v1407_v31 = vsel %vm1386_vm2, %v1406_v30, 0.0 }
 0x3fb   : > { %1408 = vadd.xlane.f32.xlu0 %v1407_v31  ;;  %v1810_v31 = vld [vmem:[%s4280_s6 + $0x18] sm:$0xff] }
 0x3fc   : > { %3255 = vmatpush3.msra.mxu0 %v1810_v31 }
 0x3fd   : > { %3256 = vmatprep.subr.mxu0 %v3896_v22 }
 0x411   : > { %1414 = vrot.lane.b32.xlu0 %v1193_v5, %s3898_s13 }
 0x415   : > { %1679 = vrot.lane.b32.xlu0 %v4308_v1, %s3899_s16 }
 0x438   : > { %v1664_v62 = vpop.permute.xlu1 %1663 }
 0x484   : > { %v1409_v36 = vpop.xlane.xlu0 %1408 }
 0x485   : > { %3461 = vrcp.f32 %v1409_v36 }
 0x488   : > { %v1415_v37 = vpop.permute.xlu0 %1414 }
 0x489   : > { %3217 = vmatpush3.msra.mxu1 %v1415_v37 }
 0x48a   : > { %3221 = vmatprep.subr.mxu1 %v3896_v22 }
 0x48c   : > { %v1680_v7 = vpop.permute.xlu0 %1679 }
 0x492   : > { %v3462_v38 = vpop.eup %3461 }
 0x493   : > { %v1411_v39 = vmul.f32 %v3462_v38, %v1406_v30 }
 0x495   : > { %3219 = vmatmul.mubr.msk.f32.vlgmr.msra.gmra.mxu1 %vm1386_vm2, %v1411_v39  ;;  %v1809_v39 = vld [vmem:[%s4280_s6 + $0x10] sm:$0xff] }
 0x496   : > { %3222 = vmatpush3.msra.mxu1 %v1496_v44  ;;  %3229 = vmatprep.mubr.msk.f32.mxu1 %vm3897_vm1, %v3896_v22  ;;  %v1808_v44 = vld [vmem:[%s4280_s6 + $0x8] sm:$0xff] }
 0x497   : > { %3223 = vmatprep.subr.mxu1 %v3896_v22  ;;  %3257 = vmatpush3.msra.mxu0 %v1809_v39 }
 0x498   : > { %3224 = vmatpush3.msra.mxu1 %v1495_v45  ;;  %3258 = vmatprep.subr.mxu0 %v3896_v22  ;;  %v1807_v45 = vld [vmem:[%s4280_s6] sm:$0xff]  ;;  %s4681_s6 = sld [smem:[#allocation45_spill]] }
 0x499   : > { %3225 = vmatprep.subr.mxu1 %v3896_v22  ;;  %3259 = vmatpush3.msra.mxu0 %v1808_v44 }
 0x49a   : > { %3226 = vmatpush3.msra.mxu1 %v1494_v46  ;;  %3260 = vmatprep.subr.mxu0 %v3896_v22  ;;  %v1206_v46 = vld [vmem:[%s4282_s8] sm:$0x3] }
 0x49b   : > { %3227 = vmatprep.subr.mxu1 %v3896_v22  ;;  %3261 = vmatpush3.msra.mxu0 %v1807_v45 }
 0x49c   : > { %3228 = vmatpush3.msra.mxu1 %v1493_v47  ;;  %3276 = vmatprep.subr.mxu0 %v3896_v22  ;;  %v1730_v47 = vrot.slane %v1206_v46, %v4365_v41  ;;  %v1986_v41 = vld [vmem:[%s902_s26 + $0x10] sm:$0xff] }
 0x49d   : > { %3243 = vmatprep.subr.mxu1 %v3896_v22 }
 0x49e   : > { %s4517_s8 = scalar_lea.vmem %s4681_s6, %s3119_s29 }
 0x555   : > { %v1489_v53 = vpop.f32.mrf.mxu1 }
 0x556   : > { %3230 = vmatmul.mubr.msk.f32.vlgmr.msra.gmra.mxu1 %vm1077_vm0, %v1489_v53  ;;  %v1901_v53 = vld [vmem:[%s4291_s24 + $0x10] sm:$0xff] }
 0x557   : > { %v3220_v54 = vpop.f32.mrf.mxu1  ;;  %3251 = vmatprep.mubr.msk.f32.mxu1 %vm3897_vm1, %v3896_v22  ;;  %3244 = vmatpush3.msra.mxu1 %v1726_v26  ;;  %v2064_v26 = vld [vmem:[%s4517_s8 + $0x8] sm:$0xff] }
 0x558   : > { %3245 = vmatprep.subr.mxu1 %v3896_v22  ;;  %v1987_v54 = vld [vmem:[%s902_s26 + $0x18] sm:$0xff] }
 0x559   : > { %3246 = vmatpush3.msra.mxu1 %v1725_v27 }
 0x55a   : > { %3247 = vmatprep.subr.mxu1 %v3896_v22 }
 0x55b   : > { %3248 = vmatpush3.msra.mxu1 %v1724_v28 }
 0x55c   : > { %3249 = vmatprep.subr.mxu1 %v3896_v22 }
 0x55d   : > { %3250 = vmatpush3.msra.mxu1 %v1723_v29 }
 0x55e   : > { %3265 = vmatprep.subr.mxu1 %v1902_v52 }
 0x616   : > { %v1570_v56 = vpop.f32.mrf.mxu1 }
 0x617   : > { %v1571_v57 = vadd.f32 %v1570_v56, %v1500_v55  ;;  %v1900_v55 = vld [vmem:[%s4291_s24 + $0x8] sm:$0xff]  ;;  %v1814_v56 = vrot.slane %v1206_v46, %v4370_v43 }
 0x618   : > { %v3231_v58 = vpop.f32.mrf.mxu1 }
 0x619   : > { %v1655_v1 = vadd.f32 %v1652_v51, %v1571_v57  ;;  %v1893_v51 = vld [vmem:[%s4288_s3] sm:$0xff]  ;;  %v1899_v58 = vld [vmem:[%s4291_s24] sm:$0xff]  ;;  %s3902_s3 = smov 80   ;;  %s3080_s24 = sshll.u32 %s4701_s20, 1 }
 0x61a   : > { %s1064_s1 = sadd.s32 %s3081_s19, %s3080_s24 }
 0x61b   : > { %v3093_v59 = vmul.f32 -1.442695, %v1655_v1  ;;  %v1984_v1 = vld [vmem:[%s902_s26] sm:$0xff]  ;;  %s3082_s29 = sshll.u32 %s1064_s1, 3 }
 0x61c   : > { %s1066_s2 = scalar_lea.vmem %s4682_s4, %s3082_s29 }
 0x61d   : > { %3463 = vpow2.f32 %v3093_v59 }
 0x62a   : > { %v3464_v60 = vpop.eup %3463 }
 0x62b   : > { %v1659_v61 = vadd.f32 1.0, %v3464_v60 }
 0x62d   : > { %3465 = vrcp.f32 %v1659_v61 }
 0x63a   : > { %v3466_v63 = vpop.eup %3465 }
 0x63b   : > { %v1666_v3 = vmul.f32 %v3466_v63, %v1664_v62  ;;  %v1673_v8 = vsub.f32 1.0, %v3466_v63  ;;  %v1682_v10 = vmul.f32 %v3466_v63, %v1680_v7 }
 0x63d   : > { %1668 = vrot.lane.b32.xlu1 %v1666_v3, %s3900_s18 }
 0x6af   : > { %v1669_v4 = vpop.permute.xlu1 %1668 }
 0x6b0   : > { %v1671_v5 = vadd.f32 %v1669_v4, %v1571_v57  ;;  %v1985_v57 = vld [vmem:[%s902_s26 + $0x8] sm:$0xff]  ;;  %s4684_s26 = sld [smem:[#allocation48_spill]] }
 0x6b2   : > { %3467 = vtanh.f32 %v1671_v5 }
 0x6bf   : > { %v3468_v6 = vpop.eup %3467 }
 0x6c0   : > { %1675 = vrot.lane.b32.xlu1 %v3468_v6, %s3898_s13 }
 0x732   : > { %v1676_v9 = vpop.permute.xlu1 %1675 }
 0x733   : > { %v1678_v11 = vmul.f32 %v1676_v9, %v1673_v8 }
 0x735   : > { %v4436_v12 = vadd.f32 %v1682_v10, %v1678_v11 }
 0x737   : > { %1685 = vrot.lane.b32.xlu1 %v4436_v12, %s3898_s13 }
 0x7a9   : > { %v1686_v13 = vpop.permute.xlu1 %1685 }
 0x7aa   : > { %v1688_v14 = vsel %vm1077_vm0, %v1686_v13, 0.0 }
 0x7ab   : > { %1689 = vadd.xlane.f32.xlu0 %v1688_v14 }
 0x7c1   : > { %1710 = vrot.lane.b32.xlu0 %v1708_v16, %s3899_s16 }
 0x834   : > { %v1690_v17 = vpop.xlane.xlu0 %1689 }
 0x835   : > { %v1691_v18 = vmul.f32 0.03125, %v1690_v17 }
 0x837   : > { %v1692_v19 = vsub.f32 %v4436_v12, %v1691_v18 }
 0x838   : > { %v1711_v33 = vpop.permute.xlu0 %1710 }
 0x839   : > { %v1693_v20 = vmul.f32 %v1692_v19, %v1692_v19 }
 0x83b   : > { %1695 = vrot.lane.b32.xlu1 %v1693_v20, %s3898_s13 }
 0x8ad   : > { %v1696_v21 = vpop.permute.xlu1 %1695 }
 0x8ae   : > { %v1698_v23 = vsel %vm1077_vm0, %v1696_v21, 0.0 }
 0x8af   : > { %1699 = vadd.xlane.f32.xlu1 %v1698_v23 }
 0x8c0   : > { %1719 = vrot.lane.b32.xlu1 %v1717_v25, %s3899_s16 }
 0x8c4   : > { %1895 = vrot.lane.b32.xlu1 %v1893_v51, %s3899_s16 }
 0x938   : > { %v1700_v40 = vpop.xlane.xlu1 %1699 }
 0x939   : > { %v1701_v30 = vmul.f32 0.03125, %v1700_v40 }
 0x93b   : > { %v1702_v42 = vadd.f32 1e-05, %v1701_v30 }
 0x93c   : > { %v1720_v35 = vpop.permute.xlu1 %1719 }
 0x93d   : > { %3469 = vrsqrt.f32 %v1702_v42 }
 0x940   : > { %v1896_v62 = vpop.permute.xlu1 %1895 }
 0x94a   : > { %v3470_v32 = vpop.eup %3469 }
 0x94b   : > { %v1704_v34 = vmul.f32 %v3470_v32, %v1692_v19 }
 0x94d   : > { %v1713_v36 = vmul.f32 %v1711_v33, %v1704_v34 }
 0x94f   : > { %v1722_v37 = vadd.f32 %v1720_v35, %v1713_v36 }
 0x951   : > { %1732 = vrot.lane.b32.xlu0 %v1722_v37, %s3898_s13 }
 0x9c3   : > { %v1733_v38 = vpop.permute.xlu0 %1732 }
 0x9c4   : > { %3252 = vmatmul.mubr.msk.f32.vlgmr.msra.gmra.mxu1 %vm1077_vm0, %v1733_v38 }
 0x9c5   : > { %3273 = vmatprep.mubr.msk.f32.mxu1 %vm1077_vm0, %v4305_v0  ;;  %3266 = vmatpush3.msra.mxu1 %v1902_v52 }
 0x9c6   : > { %3267 = vmatprep.subr.mxu1 %v1901_v53 }
 0x9c7   : > { %3268 = vmatpush3.msra.mxu1 %v1901_v53 }
 0x9c8   : > { %3269 = vmatprep.subr.mxu1 %v1900_v55 }
 0x9c9   : > { %3270 = vmatpush3.msra.mxu1 %v1900_v55 }
 0x9ca   : > { %3271 = vmatprep.subr.mxu1 %v1899_v58 }
 0x9cb   : > { %3272 = vmatpush3.msra.mxu1 %v1899_v58 }
 0x9cc   : > { %3274 = vmatmul.mubr.msk.f32.vlgmr.msra.gmra.mxu1 %vm1077_vm0, %v4310_v2 }
 0xa84   : > { %v1802_v0 = vpop.f32.mrf.mxu1 }
 0xa85   : > { %v1803_v48 = vadd.f32 %v1802_v0, %v1730_v47  ;;  %v2063_v0 = vld [vmem:[%s4517_s8] sm:$0xff] }
 0xa86   : > { %v3253_v49 = vpop.f32.mrf.mxu1 }
 0xa87   : > { %v1806_v50 = vmax.f32 %v1803_v48, 0.0 }
 0xa89   : > { %3263 = vmatmul.mubr.msk.f32.vlgmr.msra.gmra.mxu0 %vm1077_vm0, %v1806_v50 }
 0xa8a   : > { %3284 = vmatprep.mubr.msk.f32.mxu0 %vm3897_vm1, %v3896_v22  ;;  %3277 = vmatpush3.msra.mxu0 %v1987_v54 }
 0xa8b   : > { %3278 = vmatprep.subr.mxu0 %v3896_v22 }
 0xa8c   : > { %3279 = vmatpush3.msra.mxu0 %v1986_v41  ;;  %v3275_v5 = vpop.f32.mrf.mxu1 }
 0xa8d   : > { %3280 = vmatprep.subr.mxu0 %v3896_v22 }
 0xa8e   : > { %3281 = vmatpush3.msra.mxu0 %v1985_v57  ;;  %v1975_v6 = vpop.f32.mrf.mxu1 }
 0xa8f   : > { %3282 = vmatprep.subr.mxu0 %v3896_v22  ;;  %3289 = vmatprep.mubr.msk.f32.mxu1 %vm1386_vm2, %v1975_v6 }
 0xa90   : > { %3283 = vmatpush3.msra.mxu0 %v1984_v1 }
 0xa91   : > { %3292 = vmatprep.subr.mxu0 %v3896_v22 }
 0xb49   : > { %v1884_v59 = vpop.f32.mrf.mxu0 }
 0xb4a   : > { %v1885_v60 = vadd.f32 %v1884_v59, %v1814_v56 }
 0xb4b   : > { %v3264_v61 = vpop.f32.mrf.mxu0 }
 0xb4c   : > { %1889 = vrot.lane.b32.xlu0 %v1885_v60, %s3899_s16 }
 0xbbe   : > { %v1890_v43 = vpop.permute.xlu0 %1889 }
 0xbbf   : > { %v1892_v63 = vadd.f32 %v1890_v43, %v4436_v12 }
 0xbc1   : > { %v1898_v3 = vadd.f32 %v1896_v62, %v1892_v63 }
 0xbc3   : > { %1989 = vrot.lane.b32.xlu0 %v1898_v3, %s3898_s13 }
 0xc35   : > { %v1990_v4 = vpop.permute.xlu0 %1989 }
 0xc36   : > { %3285 = vmatmul.mubr.msk.f32.vlgmr.msra.gmra.mxu0 %vm1077_vm0, %v1990_v4 }
 0xc37   : > { %3294 = vmatprep.mubr.msk.f32.mxu0 %vm3897_vm1, %v3896_v22 }
 0xcf6   : > { %v4495_v2 = vpop.f32.mrf.mxu0 }
 0xcf7   : > { %3287 = vmatprep.subr.msk.mxu1 %vm1386_vm2, %v4495_v2 }
 0xcf8   : > { %v3286_v7 = vpop.f32.mrf.mxu0  ;;  %3288 = vmatpush3.xpose.msk.msra.mxu1 %vm1386_vm2, %v4495_v2 }
 0xcf9   : > { %3297 = vmatprep.subr.mxu1 %v3896_v22 }
 0xcfb   : > { %3290 = vmatmul.mubr.msk.f32.vlgmr.msra.gmra.mxu1 %vm1386_vm2, %v3275_v5 }
 0xcfc   : > { %3301 = vmatprep.mubr.msk.f32.mxu1 %vm3897_vm1, %v3896_v22  ;;  %3298 = vmatpush3.msra.mxu1 %v2064_v26 }
 0xcfd   : > { %3299 = vmatprep.subr.mxu1 %v3896_v22 }
 0xcfe   : > { %3300 = vmatpush3.msra.mxu1 %v2063_v0 }
 0xcff   : > { %3309 = vmatprep.subr.mxu1 %v3896_v22 }
 0xdbb   : > { %v3291_v8 = vpop.f32.mrf.mxu1 }
 0xdbc   : > { %v2153_v9 = vmul.f32 0.25, %v3291_v8 }
 0xdbd   : > { %v2143_v10 = vpop.f32.mrf.mxu1 }
 0xdbe   : > { %v2152_v11 = vmul.f32 0.25, %v2143_v10  ;;  %v2158_v12 = vsel %vm2154_vm3, %v2153_v9, -inf }
 0xdbf   : > { %2159 = vmax.xlane.f32.xlu0 %v2158_v12 }
 0xdc0   : > { %v2155_v13 = vsel %vm2154_vm3, %v2152_v11, -inf }
 0xdc1   : > { %2156 = vmax.xlane.f32.xlu1 %v2155_v13 }
 0xdd2   : > { %2188 = vrot.lane.b32.xlu1 %v4495_v2, %s3898_s13  ;;  %s1072_s13 = sadd.s32 %s3083_s15, %s4701_s20 }
 0xdd6   : > { %2338 = vrot.lane.b32.xlu1 %v1975_v6, %s3901_s23 }
 0xdda   : > { %2340 = vrot.lane.b32.xlu1 %v3275_v5, %s3901_s23  ;;  %v2066_v5 = vld [vmem:[%s4517_s8 + $0x18] sm:$0xff] }
 0xe48   : > { %v2160_v14 = vpop.xlane.xlu0 %2159 }
 0xe49   : > { %v2162_v15 = vsub.f32 %v2153_v9, %v2160_v14 }
 0xe4a   : > { %v2157_v16 = vpop.xlane.xlu1 %2156 }
 0xe4b   : > { %v2161_v17 = vsub.f32 %v2152_v11, %v2157_v16  ;;  %v2165_v18 = vmul.f32 1.442695, %v2162_v15 }
 0xe4d   : > { %v2163_v19 = vmul.f32 1.442695, %v2161_v17 }
 0xe4e   : > { %v2189_v20 = vpop.permute.xlu1 %2188 }
 0xe4f   : > { %3471 = vpow2.f32 %v2163_v19  ;;  %3293 = vmatpush3.msra.mxu0 %v2189_v20 }
 0xe50   : > { %3473 = vpow2.f32 %v2165_v18 }
 0xe52   : > { %v2339_v45 = vpop.permute.xlu1 %2338 }
 0xe56   : > { %v2341_v47 = vpop.permute.xlu1 %2340 }
 0xe5c   : > { %v3472_v21 = vpop.eup %3471 }
 0xe5d   : > { %v2167_v23 = vsel %vm2154_vm3, %v3472_v21, 0.0  ;;  %v3474_v24 = vpop.eup %3473 }
 0xe5e   : > { %2168 = vadd.xlane.f32.xlu0 %v2167_v23  ;;  %v2170_v25 = vsel %vm2154_vm3, %v3474_v24, 0.0 }
 0xe62   : > { %2171 = vadd.xlane.f32.xlu0 %v2170_v25  ;;  %v2065_v25 = vld [vmem:[%s4517_s8 + $0x10] sm:$0xff] }
 0xe78   : > { %2342 = vrot.lane.b32.xlu0 %v4495_v2, %s3901_s23  ;;  %s1073_s23 = scalar_lea.vmem %s4684_s26, %s1072_s13 }
 0xee7   : > { %v2169_v27 = vpop.xlane.xlu0 %2168 }
 0xee8   : > { %3475 = vrcp.f32 %v2169_v27 }
 0xeeb   : > { %v2172_v28 = vpop.xlane.xlu0 %2171 }
 0xeec   : > { %3477 = vrcp.f32 %v2172_v28  ;;  %v2067_v28 = vld [vmem:[%s1057_s21] sm:$0x1] }
 0xeef   : > { %v2343_v29 = vpop.permute.xlu0 %2342 }
 0xef0   : > { %3304 = vmatprep.subr.msk.mxu0 %vm1386_vm2, %v2343_v29 }
 0xef5   : > { %v3476_v40 = vpop.eup %3475 }
 0xef6   : > { %v4522_v30 = vmul.f32 %v3476_v40, %v3472_v21 }
 0xef8   : > { %v2177_v32 = vsel %vm2154_vm3, %v4522_v30, 0.0 }
 0xef9   : > { %v3478_v42 = vpop.eup %3477 }
 0xefa   : > { %v4524_v31 = vmul.f32 %v3478_v42, %v3474_v24 }
 0xefc   : > { %v2178_v33 = vsel %vm2154_vm3, %v4524_v31, 0.0 }
 0xefd   : > { %v2179_v34 = vadd.f32 %v2178_v33, %v2177_v32 }
 0xeff   : > { %v2180_v35 = vrot.slane %v2179_v34, 4 }
 0xf01   : > { %v2181_v36 = vadd.f32 %v2180_v35, %v2179_v34 }
 0xf03   : > { %v2182_v37 = vrot.slane %v2181_v36, 2 }
 0xf05   : > { %v2183_v38 = vadd.f32 %v2182_v37, %v2181_v36 }
 0xf07   : > { %v2184_v39 = vrot.slane %v2183_v38, 1 }
 0xf09   : > { %v2185_v44 = vadd.f32 %v2184_v39, %v2183_v38 }
 0xf0b   : > { %v2187_v46 = vmul.f32 0.0625, %v2185_v44 }
 0xf0d   : > { %3295 = vmatmul.mubr.msk.f32.vlgmr.msra.gmra.mxu0 %vm2154_vm3, %v2187_v46 }
 0xf0e   : > { %3305 = vmatpush3.xpose.msk.msra.mxu0 %vm1386_vm2, %v2343_v29  ;;  %3306 = vmatprep.mubr.msk.f32.mxu0 %vm1386_vm2, %v2339_v45 }
 0xf0f   : > { %3314 = vmatprep.subr.mxu0 %v3896_v22 }
 0xf11   : > { %3307 = vmatmul.mubr.msk.f32.vlgmr.msra.gmra.mxu0 %vm1386_vm2, %v2341_v47 }
 0xf12   : > { %3318 = vmatprep.mubr.msk.f32.mxu0 %vm3897_vm1, %v3896_v22  ;;  %3315 = vmatpush3.msra.mxu0 %v2066_v5 }
 0xf13   : > { %3316 = vmatprep.subr.mxu0 %v3896_v22 }
 0xf14   : > { %3317 = vmatpush3.msra.mxu0 %v2065_v25 }
 0xfcd   : > { %v2260_v48 = vpop.f32.mrf.mxu0 }
 0xfce   : > { %3302 = vmatmul.mubr.msk.f32.vlgmr.msra.gmra.mxu1 %vm1386_vm2, %v2260_v48 }
 0xfcf   : > { %v3296_v49 = vpop.f32.mrf.mxu0  ;;  %3311 = vmatprep.mubr.msk.f32.mxu1 %vm3897_vm1, %v3896_v22 }
 0xfd1   : > { %v3308_v50 = vpop.f32.mrf.mxu0 }
 0xfd2   : > { %v2426_v51 = vmul.f32 0.25, %v3308_v50 }
 0xfd3   : > { %v2416_v52 = vpop.f32.mrf.mxu0 }
 0xfd4   : > { %v2425_v53 = vmul.f32 0.25, %v2416_v52  ;;  %v2430_v54 = vsel %vm2154_vm3, %v2426_v51, -inf }
 0xfd5   : > { %2431 = vmax.xlane.f32.xlu0 %v2430_v54 }
 0xfd6   : > { %v2427_v41 = vsel %vm2154_vm3, %v2425_v53, -inf }
 0xfd7   : > { %2428 = vmax.xlane.f32.xlu1 %v2427_v41 }
 0xfe8   : > { %2461 = vrot.lane.b32.xlu1 %v4495_v2, %s3902_s3 }
0x105e   : > { %v2432_v55 = vpop.xlane.xlu0 %2431 }
0x105f   : > { %v2434_v56 = vsub.f32 %v2426_v51, %v2432_v55 }
0x1060   : > { %v2429_v57 = vpop.xlane.xlu1 %2428 }
0x1061   : > { %v2433_v58 = vsub.f32 %v2425_v53, %v2429_v57  ;;  %v2437_v1 = vmul.f32 1.442695, %v2434_v56 }
0x1063   : > { %v2435_v59 = vmul.f32 1.442695, %v2433_v58 }
0x1064   : > { %v2462_v60 = vpop.permute.xlu1 %2461 }
0x1065   : > { %3479 = vpow2.f32 %v2435_v59  ;;  %3310 = vmatpush3.msra.mxu1 %v2462_v60 }
0x1066   : > { %3481 = vpow2.f32 %v2437_v1 }
0x1072   : > { %v3480_v61 = vpop.eup %3479 }
0x1073   : > { %v2439_v43 = vsel %vm2154_vm3, %v3480_v61, 0.0  ;;  %v3482_v62 = vpop.eup %3481 }
0x1074   : > { %2440 = vadd.xlane.f32.xlu0 %v2439_v43  ;;  %v2442_v63 = vsel %vm2154_vm3, %v3482_v62, 0.0 }
0x1078   : > { %2443 = vadd.xlane.f32.xlu0 %v2442_v63 }
0x108e   : > { %v2333_v3 = vpop.f32.mrf.mxu1 }
0x108f   : > { %v2337_v29 = vadd.f32 %v2333_v3, %v2067_v28 }
0x1090   : > { %v3303_v4 = vpop.f32.mrf.mxu1 }
0x10fd   : > { %v2441_v6 = vpop.xlane.xlu0 %2440 }
0x10fe   : > { %3483 = vrcp.f32 %v2441_v6 }
0x1101   : > { %v2444_v2 = vpop.xlane.xlu0 %2443 }
0x1102   : > { %3485 = vrcp.f32 %v2444_v2 }
0x110b   : > { %v3484_v7 = vpop.eup %3483 }
0x110c   : > { %v2447_v8 = vmul.f32 %v3484_v7, %v3480_v61 }
0x110e   : > { %v2449_v9 = vadd.f32 %v2447_v8, %v4522_v30  ;;  %v2451_v22 = vsel %vm2154_vm3, %v2447_v8, 0.0 }
0x110f   : > { %v3486_v10 = vpop.eup %3485 }
0x1110   : > { %v2611_v11 = vmul.f32 0.5, %v2449_v9  ;;  %v2448_v12 = vmul.f32 %v3486_v10, %v3482_v62 }
0x1112   : > { %2613 = vst.msk [vmem:[%s1066_s2] sm:$0xff] %vm2154_vm3, %v2611_v11  ;;  %v2450_v13 = vadd.f32 %v2448_v12, %v4524_v31  ;;  %v2452_v14 = vsel %vm2154_vm3, %v2448_v12, 0.0 }
0x1113   : > { %v2453_v15 = vadd.f32 %v2452_v14, %v2451_v22 }
0x1114   : > { %v2612_v16 = vmul.f32 0.5, %v2450_v13 }
0x1115   : > { %v2454_v17 = vrot.slane %v2453_v15, 4 }
0x1116   : > { %2614 = vst.msk [vmem:[%s1066_s2 + $0x8] sm:$0xff] %vm2154_vm3, %v2612_v16 }
0x1117   : > { %v2455_v18 = vadd.f32 %v2454_v17, %v2453_v15 }
0x1119   : > { %v2456_v19 = vrot.slane %v2455_v18, 2 }
0x111b   : > { %v2457_v20 = vadd.f32 %v2456_v19, %v2455_v18 }
0x111d   : > { %v2458_v21 = vrot.slane %v2457_v20, 1 }
0x111f   : > { %v2459_v23 = vadd.f32 %v2458_v21, %v2457_v20 }
0x1121   : > { %v2460_v24 = vmul.f32 0.0625, %v2459_v23 }
0x1123   : > { %3312 = vmatmul.mubr.msk.f32.vlgmr.msra.gmra.mxu1 %vm2154_vm3, %v2460_v24 }
0x11e3   : > { %v2533_v26 = vpop.f32.mrf.mxu1 }
0x11e4   : > { %3319 = vmatmul.mubr.msk.f32.vlgmr.msra.gmra.mxu0 %vm1386_vm2, %v2533_v26 }
0x11e5   : > { %v3313_v27 = vpop.f32.mrf.mxu1 }
0x12a4   : > { %v2606_v40 = vpop.f32.mrf.mxu0 }
0x12a5   : > { %v2610_v30 = vadd.f32 %v2606_v40, %v2337_v29 }
0x12a6   : > { %v3320_v42 = vpop.f32.mrf.mxu0 }
0x12a7   : > { %2616 = vst.msk [vmem:[%s1073_s23] sm:$0x1] %vm2615_vm4, %v2610_v30 }
0x12a8 PF: > { %s4685_s11 = sld [smem:[#allocation30_spill]]  ;;  %s4692_s28 = smov %s3877_s0 }
0x12a9   : > { %s4686_s24 = sld [smem:[#allocation25_spill]] }
0x12aa   : > { %s4687_s25 = sld [smem:[#allocation26_spill]] }
0x12ab   : > { %s4688_s26 = sld [smem:[#allocation34_spill]] }
0x12ac   : > { %s4689_s27 = sld [smem:[#allocation29_spill]] }
0x12ad   : > { %s4690_s29 = sld [smem:[#allocation31_spill]] }
0x12ae   : > { %s46_s30 = sadd.s32 1, %s4685_s11   ;;  %s4691_s20 = sld [smem:[#allocation32_spill]] }
0x12af   : > { %p43_p11 = scmp.ge.s32.totalorder %s46_s30, 8  }
0x12b1   :  { %45 = sbr.rel (!%p43_p11) target bundleno = 29 (0x1d), region = 271 }
0x12b4   : > { %s4693_s0 = smov %s4691_s20 }
0x12b6   :  { %2666 = vsyncpa [#allocation3], 1 }
0x12b7   :  { %2668 = vsyncpa [#allocation3 + $0x1], 1 }
0x12b8   :  { %2669 = vsyncpa [#allocation5], 1 }
0x12b9   :  { %2671 = vsyncpa [#allocation5 + $0x1], 1 }
0x12ba   :  { %2672 = vsyncpa [#allocation8], 1 }
0x12bb   :  { %2674 = vsyncpa [#allocation8 + $0x1], 1 }
0x12bc   :  { %2675 = vsyncpa [#allocation11], 1 }
0x12bd   :  { %2677 = vsyncpa [#allocation11 + $0x1], 1 }
0x12be   :  { %2678 = vsyncpa [#allocation14], 1 }
0x12bf   :  { %2680 = vsyncpa [#allocation14 + $0x1], 1 }
0x12c0   :  { %2681 = vsyncpa [#allocation17], 1 }
0x12c1   :  { %2683 = vsyncpa [#allocation17 + $0x1], 1 }

</bundles_post_ra>
